<compile_context>
chip_gen: v6e
topology: v6e:2x2x1
jax: 0.10.0
libtpu: 0.0.40
codegen_flags: <defaults>
</compile_context>

<pallas_src>
import functools

import jax
import jax.numpy as jnp
from jax.experimental import pallas as pl
from jax.experimental.pallas import tpu as pltpu

IN_DIM = 129 * 129        # K = 16641
HID = 32
OUT = 2
OUT_PAD = 128             # lane-dense output width (sliced back to OUT in wrapper)
TK = 4224                 # K tile (33 * 128) -> 4 pipeline steps over K
TM_MAX = 256              # batch tile cap


def _round_up(x, m):
    return ((x + m - 1) // m) * m


def _mlp_kernel(x_ref, w1_ref, b1_ref, w2_ref, b2_ref, o_ref, acc_ref, *, k_dim, tk):
    k = pl.program_id(1)
    nk = pl.num_programs(1)

    @pl.when(k == 0)
    def _():
        acc_ref[...] = jnp.zeros_like(acc_ref)

    # Mask out-of-range columns of the (partial) last K tile. W1 is zero-padded over
    # the same range, so masked columns contribute exactly 0 (cheap VPU filler work).
    x_blk = x_ref[...]
    col = jax.lax.broadcasted_iota(jnp.int32, x_blk.shape, 1) + k * tk
    x_blk = jnp.where(col < k_dim, x_blk, 0.0)

    # fc1 partial product on the MXU, accumulated in f32 VMEM scratch.
    acc_ref[...] += jnp.dot(x_blk, w1_ref[...], preferred_element_type=jnp.float32)

    @pl.when(k == nk - 1)
    def _():
        h = jnp.maximum(acc_ref[...] + b1_ref[...], 0.0)     # bias + relu (dropout p=0 elided)
        o_ref[...] = (
            jnp.dot(h, w2_ref[...], preferred_element_type=jnp.float32) + b2_ref[...]
        )


def prepare_params(w1, b1, w2, b2, *, tk=TK):
    """One-time weight prep (hoisted out of the per-call path).

    w1: (32, 16641), b1: (32,), w2: (2, 32), b2: (2,)   [PyTorch (out, in) layout]
    """
    k_dim = w1.shape[1]
    k_pad = _round_up(k_dim, tk)
    w1_p = jnp.pad(w1.T.astype(jnp.float32), ((0, k_pad - k_dim), (0, 0)))       # (Kp, 32)
    b1_r = b1.reshape(1, HID).astype(jnp.float32)                                # (1, 32)
    w2_p = jnp.pad(w2.T.astype(jnp.float32), ((0, 0), (0, OUT_PAD - OUT)))       # (32, 128)
    b2_p = jnp.pad(b2.reshape(1, OUT).astype(jnp.float32), ((0, 0), (0, OUT_PAD - OUT)))
    return w1_p, b1_r, w2_p, b2_p


@functools.partial(jax.jit, static_argnames=("tm", "tk"))
def fbaseline_forward(adj, w1_p, b1_r, w2_p, b2_p, *, tm=TM_MAX, tk=TK):
    """adj: (B, 129, 129) f32; weights pre-prepped by prepare_params.

    Returns (logits (B, 2), reg (1,)) matching the PyTorch module."""
    B = adj.shape[0]
    x = adj.reshape(B, -1).astype(jnp.float32)     # free reshape; NOT padded in HBM
    k_dim = x.shape[1]

    tm_eff = min(tm, _round_up(B, 8))
    grid_m = pl.cdiv(B, tm_eff)
    grid_k = pl.cdiv(k_dim, tk)
    assert w1_p.shape[0] == grid_k * tk, "weights not prepped for this tk"

    kernel = functools.partial(_mlp_kernel, k_dim=k_dim, tk=tk)

    out = pl.pallas_call(
        kernel,
        out_shape=jax.ShapeDtypeStruct((B, OUT_PAD), jnp.float32),
        grid_spec=pltpu.PrefetchScalarGridSpec(
            num_scalar_prefetch=0,
            grid=(grid_m, grid_k),
            in_specs=[
                pl.BlockSpec((tm_eff, tk), lambda m, k: (m, k)),       # x tile
                pl.BlockSpec((tk, HID), lambda m, k: (k, 0)),          # W1 tile
                pl.BlockSpec((1, HID), lambda m, k: (0, 0)),           # b1
                pl.BlockSpec((HID, OUT_PAD), lambda m, k: (0, 0)),     # W2 (lane-padded)
                pl.BlockSpec((1, OUT_PAD), lambda m, k: (0, 0)),       # b2 (lane-padded)
            ],
            out_specs=pl.BlockSpec((tm_eff, OUT_PAD), lambda m, k: (m, 0)),
            scratch_shapes=[pltpu.VMEM((tm_eff, HID), jnp.float32)],
        ),
        compiler_params=pltpu.CompilerParams(
            dimension_semantics=("parallel", "arbitrary"),
        ),
    )(x, w1_p, b1_r, w2_p, b2_p)

    logits = out[:, :OUT]
    reg = jnp.zeros((1,), dtype=jnp.float32)
    return logits, reg


def _init_params(key):
    # Deterministic synthetic init (PyTorch-like uniform fan-in bounds).
    k1, k2, k3, k4 = jax.random.split(key, 4)
    bound1 = 1.0 / (IN_DIM ** 0.5)
    bound2 = 1.0 / (HID ** 0.5)
    w1 = jax.random.uniform(k1, (HID, IN_DIM), jnp.float32, -bound1, bound1)
    b1 = jax.random.uniform(k2, (HID,), jnp.float32, -bound1, bound1)
    w2 = jax.random.uniform(k3, (OUT, HID), jnp.float32, -bound2, bound2)
    b2 = jax.random.uniform(k4, (OUT,), jnp.float32, -bound2, bound2)
    return w1, b1, w2, b2


if __name__ == "__main__":
    key = jax.random.PRNGKey(0)
    kp, kx = jax.random.split(key)
    w1, b1, w2, b2 = _init_params(kp)

    # One-time weight prep (static across forward calls).
    params = prepare_params(w1, b1, w2, b2)

    B = 8
    adj = jax.random.normal(kx, (B, 129, 129), jnp.float32)

    logits, reg = fbaseline_forward(adj, *params)
    jax.block_until_ready((logits, reg))

    # Reference check in plain JAX.
    x_ref = adj.reshape(B, -1)
    ref = jnp.maximum(x_ref @ w1.T + b1, 0.0) @ w2.T + b2
    assert logits.shape == (B, 2) and reg.shape == (1,)
    assert jnp.allclose(logits, ref, atol=1e-3, rtol=1e-3), float(
        jnp.max(jnp.abs(logits - ref))
    )

    print("KERNEL_OK")
</pallas_src>

<mosaic_0001>
module attributes {stable_mosaic.version = 11 : i64} {
  func.func @_mlp_kernel(%arg0: i32, %arg1: i32, %arg2: memref<8x4224xf32, #tpu.memory_space<vmem>>, %arg3: memref<4224x32xf32, #tpu.memory_space<vmem>>, %arg4: memref<1x32xf32, #tpu.memory_space<vmem>>, %arg5: memref<32x128xf32, #tpu.memory_space<vmem>>, %arg6: memref<1x128xf32, #tpu.memory_space<vmem>>, %arg7: memref<8x128xf32, #tpu.memory_space<vmem>>, %arg8: memref<8x32xf32, #tpu.memory_space<vmem>>) attributes {dimension_semantics = [#tpu.dimension_semantics<parallel>, #tpu.dimension_semantics<arbitrary>], iteration_bounds = array<i64: 1, 4>, scalar_prefetch = 0 : i64, scratch_operands = 1 : i64, tpu.core_type = #tpu.core_type<tc>, window_params = [{transform_indices = @transform_0, window_bounds = array<i64: 8, 4224>}, {transform_indices = @transform_1, window_bounds = array<i64: 4224, 32>}, {pipeline_mode = #tpu.pipeline_mode<synchronous>, transform_indices = @transform_2, window_bounds = array<i64: 1, 32>}, {pipeline_mode = #tpu.pipeline_mode<synchronous>, transform_indices = @transform_3, window_bounds = array<i64: 32, 128>}, {pipeline_mode = #tpu.pipeline_mode<synchronous>, transform_indices = @transform_4, window_bounds = array<i64: 1, 128>}, {transform_indices = @transform_5, window_bounds = array<i64: 8, 128>}]} {
    %c0_i32 = arith.constant 0 : i32
    %0 = arith.cmpi eq, %arg1, %c0_i32 : i32
    %1 = arith.extui %0 : i1 to i32
    %c0_i32_0 = arith.constant 0 : i32
    %2 = arith.cmpi ne, %1, %c0_i32_0 : i32
    scf.if %2 {
      %cst_10 = arith.constant 0.000000e+00 : f32
      %20 = vector.broadcast %cst_10 : f32 to vector<8x32xf32>
      %c0_11 = arith.constant 0 : index
      %c0_12 = arith.constant 0 : index
      %21 = vector.load %arg8[%c0_11, %c0_12] : memref<8x32xf32, #tpu.memory_space<vmem>>, vector<8x32xf32>
      tpu.vector_store %arg8[%c0_11, %c0_12], %20 {strides = array<i32>} : memref<8x32xf32, #tpu.memory_space<vmem>>, vector<8x32xf32>,
    } else {
    }
    %c0 = arith.constant 0 : index
    %c0_1 = arith.constant 0 : index
    %3 = vector.load %arg2[%c0, %c0_1] : memref<8x4224xf32, #tpu.memory_space<vmem>>, vector<8x4224xf32>
    %4 = tpu.iota {dimensions = array<i32: 1>} : vector<8x4224xi32>
    %c4224_i32 = arith.constant 4224 : i32
    %5 = arith.muli %arg1, %c4224_i32 : i32
    %6 = vector.broadcast %5 : i32 to vector<8x4224xi32>
    %7 = arith.addi %4, %6 : vector<8x4224xi32>
    %c16641_i32 = arith.constant 16641 : i32
    %8 = vector.broadcast %c16641_i32 : i32 to vector<8x4224xi32>
    %9 = arith.cmpi slt, %7, %8 : vector<8x4224xi32>
    %cst = arith.constant 0.000000e+00 : f32
    %10 = vector.broadcast %cst : f32 to vector<8x4224xf32>
    %11 = arith.select %9, %3, %10 : vector<8x4224xi1>, vector<8x4224xf32>
    %c0_2 = arith.constant 0 : index
    %c0_3 = arith.constant 0 : index
    %12 = vector.load %arg8[%c0_2, %c0_3] : memref<8x32xf32, #tpu.memory_space<vmem>>, vector<8x32xf32>
    %c0_4 = arith.constant 0 : index
    %c0_5 = arith.constant 0 : index
    %13 = vector.load %arg3[%c0_4, %c0_5] : memref<4224x32xf32, #tpu.memory_space<vmem>>, vector<4224x32xf32>
    %cst_6 = arith.constant dense<0.000000e+00> : vector<8x32xf32>
    %14 = tpu.matmul %11, %13, %cst_6 {dimension_numbers = #tpu.dot_dimension_numbers<[1], [0], [0], [1], [0, 0, 1, 1], [], []>} : vector<8x4224xf32>, vector<4224x32xf32>, vector<8x32xf32> -> vector<8x32xf32>
    %15 = arith.addf %12, %14 : vector<8x32xf32>
    %c0_7 = arith.constant 0 : index
    %c0_8 = arith.constant 0 : index
    %16 = vector.load %arg8[%c0_7, %c0_8] : memref<8x32xf32, #tpu.memory_space<vmem>>, vector<8x32xf32>
    tpu.vector_store %arg8[%c0_7, %c0_8], %15 {strides = array<i32>} : memref<8x32xf32, #tpu.memory_space<vmem>>, vector<8x32xf32>,
    %c3_i32 = arith.constant 3 : i32
    %17 = arith.cmpi eq, %arg1, %c3_i32 : i32
    %18 = arith.extui %17 : i1 to i32
    %c0_i32_9 = arith.constant 0 : i32
    %19 = arith.cmpi ne, %18, %c0_i32_9 : i32
    scf.if %19 {
      %c0_10 = arith.constant 0 : index
      %c0_11 = arith.constant 0 : index
      %20 = vector.load %arg8[%c0_10, %c0_11] : memref<8x32xf32, #tpu.memory_space<vmem>>, vector<8x32xf32>
      %c0_12 = arith.constant 0 : index
      %c0_13 = arith.constant 0 : index
      %21 = vector.load %arg4[%c0_12, %c0_13] : memref<1x32xf32, #tpu.memory_space<vmem>>, vector<1x32xf32>
      %22 = vector.broadcast %21 : vector<1x32xf32> to vector<8x32xf32>
      %23 = arith.addf %20, %22 : vector<8x32xf32>
      %cst_14 = arith.constant 0.000000e+00 : f32
      %24 = vector.broadcast %cst_14 : f32 to vector<8x32xf32>
      %25 = arith.maximumf %23, %24 : vector<8x32xf32>
      %c0_15 = arith.constant 0 : index
      %c0_16 = arith.constant 0 : index
      %26 = vector.load %arg5[%c0_15, %c0_16] : memref<32x128xf32, #tpu.memory_space<vmem>>, vector<32x128xf32>
      %cst_17 = arith.constant dense<0.000000e+00> : vector<8x128xf32>
      %27 = tpu.matmul %25, %26, %cst_17 {dimension_numbers = #tpu.dot_dimension_numbers<[1], [0], [0], [1], [0, 0, 1, 1], [], []>} : vector<8x32xf32>, vector<32x128xf32>, vector<8x128xf32> -> vector<8x128xf32>
      %c0_18 = arith.constant 0 : index
      %c0_19 = arith.constant 0 : index
      %28 = vector.load %arg6[%c0_18, %c0_19] : memref<1x128xf32, #tpu.memory_space<vmem>>, vector<1x128xf32>
      %29 = vector.broadcast %28 : vector<1x128xf32> to vector<8x128xf32>
      %30 = arith.addf %27, %29 : vector<8x128xf32>
      %c0_20 = arith.constant 0 : index
      %c0_21 = arith.constant 0 : index
      %31 = vector.load %arg7[%c0_20, %c0_21] : memref<8x128xf32, #tpu.memory_space<vmem>>, vector<8x128xf32>
      tpu.vector_store %arg7[%c0_20, %c0_21], %30 {strides = array<i32>} : memref<8x128xf32, #tpu.memory_space<vmem>>, vector<8x128xf32>,
    } else {
    }
    return
  }
  func.func @transform_0(%arg0: i32, %arg1: i32) -> (i32, i32) {
    %c0_i32 = arith.constant 0 : i32
    return %arg0, %arg1 : i32, i32
  }
  func.func @transform_1(%arg0: i32, %arg1: i32) -> (i32, i32) {
    %c0_i32 = arith.constant 0 : i32
    %c0_i32_0 = arith.constant 0 : i32
    return %arg1, %c0_i32 : i32, i32
  }
  func.func @transform_2(%arg0: i32, %arg1: i32) -> (i32, i32) {
    %c0_i32 = arith.constant 0 : i32
    %c0_i32_0 = arith.constant 0 : i32
    %c0_i32_1 = arith.constant 0 : i32
    return %c0_i32, %c0_i32_0 : i32, i32
  }
  func.func @transform_3(%arg0: i32, %arg1: i32) -> (i32, i32) {
    %c0_i32 = arith.constant 0 : i32
    %c0_i32_0 = arith.constant 0 : i32
    %c0_i32_1 = arith.constant 0 : i32
    return %c0_i32, %c0_i32_0 : i32, i32
  }
  func.func @transform_4(%arg0: i32, %arg1: i32) -> (i32, i32) {
    %c0_i32 = arith.constant 0 : i32
    %c0_i32_0 = arith.constant 0 : i32
    %c0_i32_1 = arith.constant 0 : i32
    return %c0_i32, %c0_i32_0 : i32, i32
  }
  func.func @transform_5(%arg0: i32, %arg1: i32) -> (i32, i32) {
    %c0_i32 = arith.constant 0 : i32
    %c0_i32_0 = arith.constant 0 : i32
    return %arg0, %c0_i32 : i32, i32
  }
}

</mosaic_0001>

<bundles_post_ra>
// kernel: fbaseline_forward.1
= control target key start
LH: loop header
LB: loop body
LE: loop exit
PB: predicated region body
PF: predicated region fallthrough
CT: control target
= control target key end

     0   :  { %s3128_s18 = smov 0   ;;  %s3130_s19 = smov 0   ;;  %s3826_s0 = inlined_call_operand.vmem [shape: f32[8,16641], index: 0, kind: input, shape index: {}]   ;;  %s3827_s1 = inlined_call_operand.vmem [shape: f32[16896,32], index: 1, kind: input, shape index: {}]   ;;  %s3828_s2 = inlined_call_operand.vmem [shape: f32[1,32], index: 2, kind: input, shape index: {}]   ;;  %s3829_s3 = inlined_call_operand.vmem [shape: f32[32,128], index: 3, kind: input, shape index: {}]   ;;  %s3830_s4 = inlined_call_operand.vmem [shape: f32[1,128], index: 4, kind: input, shape index: {}]   ;;  %s3831_s5 = inlined_call_operand.vmem [shape: f32[8,128], index: 5, kind: output, shape index: {}]  }
   0x1   :  { %s3132_s20 = smov 0  }
   0x2 LB: > { %s24_s21 = sadd.s32 1, %s3087_s19  ;;  %p2368_p0 = scmp.ge.s32.totalorder %s3091_s20, 1  ;;  %s3091_s20 = sphi %s3132_s20, %s15_s20   ;;  %s3087_s19 = sphi %s3130_s19, %s3833_s19   ;;  %s3083_s18 = sphi %s3128_s18, %s3832_s18  }
   0x3   : > { %p25_p1 = scmp.ge.s32.totalorder %s24_s21, 4  ;;  %p225_p2 = scmp.lt.s32.totalorder %s3091_s20, 5 }
   0x5   : > { %s3835_s21 = smov (%p25_p1, %s24_s21), 0  ;;  %p226_p3 = pnand %p2368_p0, %p225_p2 }
   0x6   : > { %s265_s22 = smul.u32 (!%p226_p3), 33, %s3083_s18  ;;  %p2371_p6 = scmp.ne.s32.totalorder (!%p226_p3), %s3083_s18, 0 }
   0x7   : > { %229 = sbr.rel (%p226_p3) target bundleno = 732 (0x2dc), region = 40 }
   0x8   : > { %s283_s23 = smul.u32 (!%p226_p3), 528, %s3083_s18  ;;  %p272_p4 = scmp.lt.s32.totalorder (!%p226_p3), %s265_s22, 130 }
   0xa   : > { %p284_p5 = scmp.lt.s32.totalorder (!%p226_p3), %s283_s23, 2111 }
   0xc   : > { %s3837_s22 = smov (!%p272_p4, %s265_s22), 130  ;;  %s3839_s23 = smov (!%p284_p5, %s283_s23), 2111 }
   0xd   : > { %s2369_s24 = sshll.u32 %s3837_s22, 3  ;;  %s2370_s28 = sshll.u32 %s3839_s23, 3 }
   0xe   : > { %s3153_s27 = scalar_lea.vmem %s3826_s0, %s2369_s24  ;;  %s3158_s6 = scalar_lea.vmem %s3827_s1, %s2370_s28 }
   0xf   : > { %296 = sbr.rel (%p2371_p6) target bundleno = 22 (0x16), region = 44 }
  0x14   : > { %vm297_vm0 = vcmask 261120   ;;  %v3093_v0 = vmov 0.0  }
  0x15   : > { %298 = vst.msk [vmem:[#allocation2] sm:$0xff] %vm297_vm0, %v3093_v0 }
  0x16 PF: > { %v499_v1 = vld [vmem:[%s3158_s6 + $0xf8] sm:$0xff]  ;;  %v498_v5 = vld [vmem:[%s3158_s6 + $0xf0] sm:$0xff]  ;;  %v497_v9 = vld [vmem:[%s3158_s6 + $0xe8] sm:$0xff]  ;;  %v332_v33 = vlaneseq  ;;  %s366_s7 = smul.u32 4224, %s3083_s18  ;;  %p2405_p7 = scmp.ne.s32.totalorder %s3083_s18, 3 }
  0x17   : > { %v531_v2 = vld [vmem:[%s3158_s6 + $0x1f8] sm:$0xff]  ;;  %2412 = vmatprep.subr.mxu0 %v499_v1  ;;  %v530_v6 = vld [vmem:[%s3158_s6 + $0x1f0] sm:$0xff]  ;;  %v529_v10 = vld [vmem:[%s3158_s6 + $0x1e8] sm:$0xff] }
  0x18   : > { %v483_v3 = vld [vmem:[%s3158_s6 + $0x78] sm:$0xff]  ;;  %2447 = vmatprep.subr.mxu1 %v531_v2  ;;  %v482_v7 = vld [vmem:[%s3158_s6 + $0x70] sm:$0xff]  ;;  %v481_v11 = vld [vmem:[%s3158_s6 + $0x68] sm:$0xff]  ;;  %v3201_v42 = vand.u32 127, %v332_v33  ;;  %v3215_v54 = vstv %s366_s7 }
  0x19   : > { %v515_v4 = vld [vmem:[%s3158_s6 + $0x178] sm:$0xff]  ;;  %2413 = vmatpush3.msra.mxu0 %v483_v3  ;;  %v514_v8 = vld [vmem:[%s3158_s6 + $0x170] sm:$0xff]  ;;  %v513_v12 = vld [vmem:[%s3158_s6 + $0x168] sm:$0xff] }
  0x1a   : > { %2448 = vmatpush3.msra.mxu1 %v515_v4  ;;  %2414 = vmatprep.subr.mxu0 %v498_v5  ;;  %v496_v13 = vld [vmem:[%s3158_s6 + $0xe0] sm:$0xff]  ;;  %v495_v17 = vld [vmem:[%s3158_s6 + $0xd8] sm:$0xff]  ;;  %v494_v21 = vld [vmem:[%s3158_s6 + $0xd0] sm:$0xff]  ;;  %v334_v51 = vadd.s32 128, %v3201_v42  ;;  %v336_v55 = vadd.s32 384, %v3201_v42  ;;  %v335_v58 = vadd.s32 256, %v3201_v42  ;;  %v368_v5 = vadd.s32 %v3215_v54, %v3201_v42 }
  0x1b   : > { %2449 = vmatprep.subr.mxu1 %v530_v6  ;;  %2415 = vmatpush3.msra.mxu0 %v482_v7  ;;  %v528_v14 = vld [vmem:[%s3158_s6 + $0x1e0] sm:$0xff]  ;;  %v527_v18 = vld [vmem:[%s3158_s6 + $0x1d8] sm:$0xff]  ;;  %v526_v22 = vld [vmem:[%s3158_s6 + $0x1d0] sm:$0xff] }
  0x1c   : > { %2450 = vmatpush3.msra.mxu1 %v514_v8  ;;  %2416 = vmatprep.subr.mxu0 %v497_v9  ;;  %v480_v15 = vld [vmem:[%s3158_s6 + $0x60] sm:$0xff]  ;;  %v479_v19 = vld [vmem:[%s3158_s6 + $0x58] sm:$0xff]  ;;  %v478_v23 = vld [vmem:[%s3158_s6 + $0x50] sm:$0xff]  ;;  %v369_v63 = vadd.s32 %v3215_v54, %v334_v51  ;;  %v371_v2 = vadd.s32 %v3215_v54, %v336_v55  ;;  %v370_v6 = vadd.s32 %v3215_v54, %v335_v58  ;;  %vm401_vm3 = vcmp.lt.s32.totalorder %v368_v5, 16641 }
  0x1d   : > { %2451 = vmatprep.subr.mxu1 %v529_v10  ;;  %v512_v16 = vld [vmem:[%s3158_s6 + $0x160] sm:$0xff]  ;;  %2417 = vmatpush3.msra.mxu0 %v481_v11  ;;  %v511_v20 = vld [vmem:[%s3158_s6 + $0x158] sm:$0xff]  ;;  %v510_v24 = vld [vmem:[%s3158_s6 + $0x150] sm:$0xff] }
  0x1e   : > { %2452 = vmatpush3.msra.mxu1 %v513_v12  ;;  %2418 = vmatprep.subr.mxu0 %v496_v13  ;;  %v493_v25 = vld [vmem:[%s3158_s6 + $0xc8] sm:$0xff]  ;;  %v492_v29 = vld [vmem:[%s3158_s6 + $0xc0] sm:$0xff]  ;;  %v491_v34 = vld [vmem:[%s3158_s6 + $0xb8] sm:$0xff]  ;;  %vm402_vm1 = vcmp.lt.s32.totalorder %v369_v63, 16641  ;;  %vm404_vm2 = vcmp.lt.s32.totalorder %v371_v2, 16641  ;;  %vm403_vm4 = vcmp.lt.s32.totalorder %v370_v6, 16641 }
  0x1f   : > { %2453 = vmatprep.subr.mxu1 %v528_v14  ;;  %2419 = vmatpush3.msra.mxu0 %v480_v15  ;;  %v525_v26 = vld [vmem:[%s3158_s6 + $0x1c8] sm:$0xff]  ;;  %v524_v30 = vld [vmem:[%s3158_s6 + $0x1c0] sm:$0xff]  ;;  %v523_v35 = vld [vmem:[%s3158_s6 + $0x1b8] sm:$0xff] }
  0x20   : > { %2454 = vmatpush3.msra.mxu1 %v512_v16  ;;  %2420 = vmatprep.subr.mxu0 %v495_v17  ;;  %v477_v27 = vld [vmem:[%s3158_s6 + $0x48] sm:$0xff]  ;;  %v476_v31 = vld [vmem:[%s3158_s6 + $0x40] sm:$0xff]  ;;  %v475_v36 = vld [vmem:[%s3158_s6 + $0x38] sm:$0xff] }
  0x21   : > { %2455 = vmatprep.subr.mxu1 %v527_v18  ;;  %2421 = vmatpush3.msra.mxu0 %v479_v19  ;;  %v509_v28 = vld [vmem:[%s3158_s6 + $0x148] sm:$0xff]  ;;  %v508_v32 = vld [vmem:[%s3158_s6 + $0x140] sm:$0xff]  ;;  %v507_v37 = vld [vmem:[%s3158_s6 + $0x138] sm:$0xff] }
  0x22   : > { %2456 = vmatpush3.msra.mxu1 %v511_v20  ;;  %2422 = vmatprep.subr.mxu0 %v494_v21  ;;  %v490_v38 = vld [vmem:[%s3158_s6 + $0xb0] sm:$0xff]  ;;  %v489_v43 = vld [vmem:[%s3158_s6 + $0xa8] sm:$0xff]  ;;  %v488_v47 = vld [vmem:[%s3158_s6 + $0xa0] sm:$0xff] }
  0x23   : > { %2457 = vmatprep.subr.mxu1 %v526_v22  ;;  %2423 = vmatpush3.msra.mxu0 %v478_v23  ;;  %v522_v39 = vld [vmem:[%s3158_s6 + $0x1b0] sm:$0xff]  ;;  %v521_v44 = vld [vmem:[%s3158_s6 + $0x1a8] sm:$0xff]  ;;  %v520_v48 = vld [vmem:[%s3158_s6 + $0x1a0] sm:$0xff] }
  0x24   : > { %2458 = vmatpush3.msra.mxu1 %v510_v24  ;;  %2424 = vmatprep.subr.mxu0 %v493_v25  ;;  %v474_v40 = vld [vmem:[%s3158_s6 + $0x30] sm:$0xff]  ;;  %v473_v45 = vld [vmem:[%s3158_s6 + $0x28] sm:$0xff]  ;;  %v472_v49 = vld [vmem:[%s3158_s6 + $0x20] sm:$0xff] }
  0x25   : > { %2459 = vmatprep.subr.mxu1 %v525_v26  ;;  %2425 = vmatpush3.msra.mxu0 %v477_v27  ;;  %v506_v41 = vld [vmem:[%s3158_s6 + $0x130] sm:$0xff]  ;;  %v505_v46 = vld [vmem:[%s3158_s6 + $0x128] sm:$0xff]  ;;  %v504_v50 = vld [vmem:[%s3158_s6 + $0x120] sm:$0xff] }
  0x26   : > { %2460 = vmatpush3.msra.mxu1 %v509_v28  ;;  %2426 = vmatprep.subr.mxu0 %v492_v29  ;;  %v487_v52 = vld [vmem:[%s3158_s6 + $0x98] sm:$0xff]  ;;  %v486_v59 = vld [vmem:[%s3158_s6 + $0x90] sm:$0xff]  ;;  %v485_v0 = vld [vmem:[%s3158_s6 + $0x88] sm:$0xff] }
  0x27   : > { %2461 = vmatprep.subr.mxu1 %v524_v30  ;;  %2427 = vmatpush3.msra.mxu0 %v476_v31  ;;  %v519_v53 = vld [vmem:[%s3158_s6 + $0x198] sm:$0xff]  ;;  %v518_v60 = vld [vmem:[%s3158_s6 + $0x190] sm:$0xff]  ;;  %v517_v1 = vld [vmem:[%s3158_s6 + $0x188] sm:$0xff] }
  0x28   : > { %2462 = vmatpush3.msra.mxu1 %v508_v32  ;;  %2428 = vmatprep.subr.mxu0 %v491_v34  ;;  %v471_v56 = vld [vmem:[%s3158_s6 + $0x18] sm:$0xff]  ;;  %v470_v61 = vld [vmem:[%s3158_s6 + $0x10] sm:$0xff]  ;;  %v469_v3 = vld [vmem:[%s3158_s6 + $0x8] sm:$0xff] }
  0x29   : > { %2463 = vmatprep.subr.mxu1 %v523_v35  ;;  %2429 = vmatpush3.msra.mxu0 %v475_v36  ;;  %v503_v57 = vld [vmem:[%s3158_s6 + $0x118] sm:$0xff]  ;;  %v502_v62 = vld [vmem:[%s3158_s6 + $0x110] sm:$0xff]  ;;  %v501_v4 = vld [vmem:[%s3158_s6 + $0x108] sm:$0xff] }
  0x2a   : > { %2464 = vmatpush3.msra.mxu1 %v507_v37  ;;  %2430 = vmatprep.subr.mxu0 %v490_v38  ;;  %v484_v7 = vld [vmem:[%s3158_s6 + $0x80] sm:$0xff]  ;;  %v300_v10 = vld [vmem:[%s3153_s27 + $0x8] sm:$0xff]  ;;  %v302_v12 = vld [vmem:[%s3153_s27 + $0x18] sm:$0xff] }
  0x2b   : > { %2465 = vmatprep.subr.mxu1 %v522_v39  ;;  %2431 = vmatpush3.msra.mxu0 %v474_v40  ;;  %v516_v8 = vld [vmem:[%s3158_s6 + $0x180] sm:$0xff]  ;;  %v301_v14 = vld [vmem:[%s3153_s27 + $0x10] sm:$0xff]  ;;  %v563_v15 = vld [vmem:[%s3158_s6 + $0x2f8] sm:$0xff] }
  0x2c   : > { %2466 = vmatpush3.msra.mxu1 %v506_v41  ;;  %2432 = vmatprep.subr.mxu0 %v489_v43  ;;  %v468_v9 = vld [vmem:[%s3158_s6] sm:$0xff]  ;;  %v595_v16 = vld [vmem:[%s3158_s6 + $0x3f8] sm:$0xff]  ;;  %v562_v19 = vld [vmem:[%s3158_s6 + $0x2f0] sm:$0xff] }
  0x2d   : > { %2467 = vmatprep.subr.mxu1 %v521_v44  ;;  %2433 = vmatpush3.msra.mxu0 %v473_v45  ;;  %v500_v11 = vld [vmem:[%s3158_s6 + $0x100] sm:$0xff]  ;;  %v547_v17 = vld [vmem:[%s3158_s6 + $0x278] sm:$0xff]  ;;  %v594_v20 = vld [vmem:[%s3158_s6 + $0x3f0] sm:$0xff] }
  0x2e   : > { %2468 = vmatpush3.msra.mxu1 %v505_v46  ;;  %2434 = vmatprep.subr.mxu0 %v488_v47  ;;  %v299_v13 = vld [vmem:[%s3153_s27] sm:$0xff]  ;;  %v579_v18 = vld [vmem:[%s3158_s6 + $0x378] sm:$0xff]  ;;  %v546_v21 = vld [vmem:[%s3158_s6 + $0x270] sm:$0xff] }
  0x2f   : > { %2469 = vmatprep.subr.mxu1 %v520_v48  ;;  %2435 = vmatpush3.msra.mxu0 %v472_v49  ;;  %v578_v22 = vld [vmem:[%s3158_s6 + $0x370] sm:$0xff]  ;;  %v561_v23 = vld [vmem:[%s3158_s6 + $0x2e8] sm:$0xff]  ;;  %v560_v27 = vld [vmem:[%s3158_s6 + $0x2e0] sm:$0xff] }
  0x30   : > { %2470 = vmatpush3.msra.mxu1 %v504_v50  ;;  %2436 = vmatprep.subr.mxu0 %v487_v52  ;;  %v593_v24 = vld [vmem:[%s3158_s6 + $0x3e8] sm:$0xff]  ;;  %v592_v28 = vld [vmem:[%s3158_s6 + $0x3e0] sm:$0xff]  ;;  %v559_v31 = vld [vmem:[%s3158_s6 + $0x2d8] sm:$0xff] }
  0x31   : > { %2471 = vmatprep.subr.mxu1 %v519_v53  ;;  %2437 = vmatpush3.msra.mxu0 %v471_v56  ;;  %v545_v25 = vld [vmem:[%s3158_s6 + $0x268] sm:$0xff]  ;;  %v544_v29 = vld [vmem:[%s3158_s6 + $0x260] sm:$0xff]  ;;  %v591_v32 = vld [vmem:[%s3158_s6 + $0x3d8] sm:$0xff] }
  0x32   : > { %2472 = vmatpush3.msra.mxu1 %v503_v57  ;;  %2438 = vmatprep.subr.mxu0 %v486_v59  ;;  %v577_v26 = vld [vmem:[%s3158_s6 + $0x368] sm:$0xff]  ;;  %v576_v30 = vld [vmem:[%s3158_s6 + $0x360] sm:$0xff]  ;;  %v543_v33 = vld [vmem:[%s3158_s6 + $0x258] sm:$0xff] }
  0x33   : > { %2473 = vmatprep.subr.mxu1 %v518_v60  ;;  %2439 = vmatpush3.msra.mxu0 %v470_v61  ;;  %v575_v34 = vld [vmem:[%s3158_s6 + $0x358] sm:$0xff]  ;;  %v558_v35 = vld [vmem:[%s3158_s6 + $0x2d0] sm:$0xff]  ;;  %v557_v39 = vld [vmem:[%s3158_s6 + $0x2c8] sm:$0xff]  ;;  %v338_v61 = vadd.s32 640, %v3201_v42 }
  0x34   : > { %2474 = vmatpush3.msra.mxu1 %v502_v62  ;;  %2440 = vmatprep.subr.mxu0 %v485_v0  ;;  %v590_v36 = vld [vmem:[%s3158_s6 + $0x3d0] sm:$0xff]  ;;  %v589_v40 = vld [vmem:[%s3158_s6 + $0x3c8] sm:$0xff]  ;;  %v556_v44 = vld [vmem:[%s3158_s6 + $0x2c0] sm:$0xff] }
  0x35   : > { %2475 = vmatprep.subr.mxu1 %v517_v1  ;;  %2441 = vmatpush3.msra.mxu0 %v469_v3  ;;  %v542_v37 = vld [vmem:[%s3158_s6 + $0x250] sm:$0xff]  ;;  %v541_v41 = vld [vmem:[%s3158_s6 + $0x248] sm:$0xff]  ;;  %v588_v45 = vld [vmem:[%s3158_s6 + $0x3c0] sm:$0xff] }
  0x36   : > { %2476 = vmatpush3.msra.mxu1 %v501_v4  ;;  %2442 = vmatprep.subr.mxu0 %v484_v7  ;;  %v574_v38 = vld [vmem:[%s3158_s6 + $0x350] sm:$0xff]  ;;  %v573_v43 = vld [vmem:[%s3158_s6 + $0x348] sm:$0xff]  ;;  %v540_v46 = vld [vmem:[%s3158_s6 + $0x240] sm:$0xff]  ;;  %v337_v4 = vadd.s32 512, %v3201_v42  ;;  %v373_v7 = vadd.s32 %v3215_v54, %v338_v61 }
  0x37   : > { %2477 = vmatprep.subr.mxu1 %v516_v8  ;;  %2443 = vmatpush3.msra.mxu0 %v468_v9  ;;  %v572_v47 = vld [vmem:[%s3158_s6 + $0x340] sm:$0xff]  ;;  %v555_v48 = vld [vmem:[%s3158_s6 + $0x2b8] sm:$0xff]  ;;  %v554_v52 = vld [vmem:[%s3158_s6 + $0x2b0] sm:$0xff]  ;;  %v340_v8 = vadd.s32 896, %v3201_v42 }
  0x38   : > { %2372 = vmatprep.mubr.msk.f32.mxu0 %vm402_vm1, %v300_v10  ;;  %2478 = vmatpush3.msra.mxu1 %v500_v11  ;;  %v587_v49 = vld [vmem:[%s3158_s6 + $0x3b8] sm:$0xff]  ;;  %v586_v53 = vld [vmem:[%s3158_s6 + $0x3b0] sm:$0xff]  ;;  %v553_v57 = vld [vmem:[%s3158_s6 + $0x2a8] sm:$0xff]  ;;  %v339_v11 = vadd.s32 768, %v3201_v42  ;;  %vm406_vm5 = vcmp.lt.s32.totalorder %v373_v7, 16641 }
  0x39   : > { %2374 = vmatprep.mubr.msk.f32.mxu1 %vm404_vm2, %v302_v12  ;;  %2373 = vmatmul.mubr.msk.f32.vlgmr.msra.gmra.mxu0 %vm401_vm3, %v299_v13  ;;  %v539_v50 = vld [vmem:[%s3158_s6 + $0x238] sm:$0xff]  ;;  %v538_v55 = vld [vmem:[%s3158_s6 + $0x230] sm:$0xff]  ;;  %v585_v58 = vld [vmem:[%s3158_s6 + $0x3a8] sm:$0xff] }
  0x3a   : > { %2375 = vmatmul.mubr.msk.f32.vlgmr.msra.gmra.mxu1 %vm403_vm4, %v301_v14  ;;  %2482 = vmatprep.subr.mxu0 %v563_v15  ;;  %v571_v51 = vld [vmem:[%s3158_s6 + $0x338] sm:$0xff]  ;;  %v570_v56 = vld [vmem:[%s3158_s6 + $0x330] sm:$0xff]  ;;  %v537_v59 = vld [vmem:[%s3158_s6 + $0x228] sm:$0xff] }
  0x3b   : > { %2517 = vmatprep.subr.mxu1 %v595_v16  ;;  %2483 = vmatpush3.msra.mxu0 %v547_v17  ;;  %v569_v60 = vld [vmem:[%s3158_s6 + $0x328] sm:$0xff]  ;;  %v552_v62 = vld [vmem:[%s3158_s6 + $0x2a0] sm:$0xff]  ;;  %v551_v2 = vld [vmem:[%s3158_s6 + $0x298] sm:$0xff]  ;;  %v372_v16 = vadd.s32 %v3215_v54, %v337_v4 }
  0x3c   : > { %2518 = vmatpush3.msra.mxu1 %v579_v18  ;;  %2484 = vmatprep.subr.mxu0 %v562_v19  ;;  %v584_v63 = vld [vmem:[%s3158_s6 + $0x3a0] sm:$0xff]  ;;  %v583_v3 = vld [vmem:[%s3158_s6 + $0x398] sm:$0xff]  ;;  %v550_v9 = vld [vmem:[%s3158_s6 + $0x290] sm:$0xff]  ;;  %v375_v19 = vadd.s32 %v3215_v54, %v340_v8 }
  0x3d   : > { %2519 = vmatprep.subr.mxu1 %v594_v20  ;;  %2485 = vmatpush3.msra.mxu0 %v546_v21  ;;  %v536_v0 = vld [vmem:[%s3158_s6 + $0x220] sm:$0xff]  ;;  %v535_v5 = vld [vmem:[%s3158_s6 + $0x218] sm:$0xff]  ;;  %v582_v10 = vld [vmem:[%s3158_s6 + $0x390] sm:$0xff]  ;;  %vm405_vm6 = vcmp.lt.s32.totalorder %v372_v16, 16641  ;;  %v341_v16 = vadd.s32 1024, %v3201_v42 }
  0x3e   : > { %2520 = vmatpush3.msra.mxu1 %v578_v22  ;;  %2486 = vmatprep.subr.mxu0 %v561_v23  ;;  %v568_v1 = vld [vmem:[%s3158_s6 + $0x320] sm:$0xff]  ;;  %v567_v6 = vld [vmem:[%s3158_s6 + $0x318] sm:$0xff]  ;;  %v534_v12 = vld [vmem:[%s3158_s6 + $0x210] sm:$0xff]  ;;  %v374_v22 = vadd.s32 %v3215_v54, %v339_v11  ;;  %vm408_vm7 = vcmp.lt.s32.totalorder %v375_v19, 16641 }
  0x3f   : > { %2521 = vmatprep.subr.mxu1 %v593_v24  ;;  %2487 = vmatpush3.msra.mxu0 %v545_v25  ;;  %v566_v13 = vld [vmem:[%s3158_s6 + $0x310] sm:$0xff]  ;;  %v549_v14 = vld [vmem:[%s3158_s6 + $0x288] sm:$0xff]  ;;  %v548_v20 = vld [vmem:[%s3158_s6 + $0x280] sm:$0xff] }
  0x40   : > { %2522 = vmatpush3.msra.mxu1 %v577_v26  ;;  %2488 = vmatprep.subr.mxu0 %v560_v27  ;;  %v581_v15 = vld [vmem:[%s3158_s6 + $0x388] sm:$0xff]  ;;  %v532_v23 = vld [vmem:[%s3158_s6 + $0x200] sm:$0xff]  ;;  %v627_v26 = vld [vmem:[%s3158_s6 + $0x4f8] sm:$0xff]  ;;  %vm407_vm8 = vcmp.lt.s32.totalorder %v374_v22, 16641 }
  0x41   : > { %2523 = vmatprep.subr.mxu1 %v592_v28  ;;  %2489 = vmatpush3.msra.mxu0 %v544_v29  ;;  %v533_v17 = vld [vmem:[%s3158_s6 + $0x208] sm:$0xff]  ;;  %v580_v24 = vld [vmem:[%s3158_s6 + $0x380] sm:$0xff]  ;;  %v306_v28 = vld [vmem:[%s3153_s27 + $0x38] sm:$0xff] }
  0x42   : > { %2524 = vmatpush3.msra.mxu1 %v576_v30  ;;  %2490 = vmatprep.subr.mxu0 %v559_v31  ;;  %v304_v18 = vld [vmem:[%s3153_s27 + $0x28] sm:$0xff]  ;;  %v303_v25 = vld [vmem:[%s3153_s27 + $0x20] sm:$0xff]  ;;  %v611_v29 = vld [vmem:[%s3158_s6 + $0x478] sm:$0xff] }
  0x43   : > { %2525 = vmatprep.subr.mxu1 %v591_v32  ;;  %2491 = vmatpush3.msra.mxu0 %v543_v33  ;;  %v565_v21 = vld [vmem:[%s3158_s6 + $0x308] sm:$0xff]  ;;  %v564_v27 = vld [vmem:[%s3158_s6 + $0x300] sm:$0xff]  ;;  %v305_v30 = vld [vmem:[%s3153_s27 + $0x30] sm:$0xff] }
  0x44   : > { %2526 = vmatpush3.msra.mxu1 %v575_v34  ;;  %2492 = vmatprep.subr.mxu0 %v558_v35  ;;  %v626_v31 = vld [vmem:[%s3158_s6 + $0x4f0] sm:$0xff]  ;;  %v659_v32 = vld [vmem:[%s3158_s6 + $0x5f8] sm:$0xff]  ;;  %v625_v35 = vld [vmem:[%s3158_s6 + $0x4e8] sm:$0xff] }
  0x45   : > { %2527 = vmatprep.subr.mxu1 %v590_v36  ;;  %2493 = vmatpush3.msra.mxu0 %v542_v37  ;;  %v610_v33 = vld [vmem:[%s3158_s6 + $0x470] sm:$0xff]  ;;  %v643_v34 = vld [vmem:[%s3158_s6 + $0x578] sm:$0xff]  ;;  %v609_v37 = vld [vmem:[%s3158_s6 + $0x468] sm:$0xff] }
  0x46   : > { %2528 = vmatpush3.msra.mxu1 %v574_v38  ;;  %2494 = vmatprep.subr.mxu0 %v557_v39  ;;  %v658_v36 = vld [vmem:[%s3158_s6 + $0x5f0] sm:$0xff]  ;;  %v624_v39 = vld [vmem:[%s3158_s6 + $0x4e0] sm:$0xff]  ;;  %v619_v61 = vld [vmem:[%s3158_s6 + $0x4b8] sm:$0xff] }
  0x47   : > { %2529 = vmatprep.subr.mxu1 %v589_v40  ;;  %2495 = vmatpush3.msra.mxu0 %v541_v41  ;;  %v642_v38 = vld [vmem:[%s3158_s6 + $0x570] sm:$0xff]  ;;  %v657_v40 = vld [vmem:[%s3158_s6 + $0x5e8] sm:$0xff]  ;;  %v608_v41 = vld [vmem:[%s3158_s6 + $0x460] sm:$0xff] }
  0x48   : > { %2530 = vmatpush3.msra.mxu1 %v573_v43  ;;  %2496 = vmatprep.subr.mxu0 %v556_v44  ;;  %v641_v43 = vld [vmem:[%s3158_s6 + $0x568] sm:$0xff]  ;;  %v623_v44 = vld [vmem:[%s3158_s6 + $0x4d8] sm:$0xff]  ;;  %v634_v8 = vld [vmem:[%s3158_s6 + $0x530] sm:$0xff] }
  0x49   : > { %2531 = vmatprep.subr.mxu1 %v588_v45  ;;  %2497 = vmatpush3.msra.mxu0 %v540_v46  ;;  %v656_v45 = vld [vmem:[%s3158_s6 + $0x5e0] sm:$0xff]  ;;  %v607_v46 = vld [vmem:[%s3158_s6 + $0x458] sm:$0xff]  ;;  %v601_v7 = vld [vmem:[%s3158_s6 + $0x428] sm:$0xff] }
  0x4a   : > { %2532 = vmatpush3.msra.mxu1 %v572_v47  ;;  %2498 = vmatprep.subr.mxu0 %v555_v48  ;;  %v640_v47 = vld [vmem:[%s3158_s6 + $0x560] sm:$0xff]  ;;  %v622_v48 = vld [vmem:[%s3158_s6 + $0x4d0] sm:$0xff]  ;;  %v635_v4 = vld [vmem:[%s3158_s6 + $0x538] sm:$0xff] }
  0x4b   : > { %2533 = vmatprep.subr.mxu1 %v587_v49  ;;  %2499 = vmatpush3.msra.mxu0 %v539_v50  ;;  %v655_v49 = vld [vmem:[%s3158_s6 + $0x5d8] sm:$0xff]  ;;  %v606_v50 = vld [vmem:[%s3158_s6 + $0x450] sm:$0xff]  ;;  %v600_v11 = vld [vmem:[%s3158_s6 + $0x420] sm:$0xff] }
  0x4c   : > { %2534 = vmatpush3.msra.mxu1 %v571_v51  ;;  %2500 = vmatprep.subr.mxu0 %v554_v52  ;;  %v639_v51 = vld [vmem:[%s3158_s6 + $0x558] sm:$0xff]  ;;  %v621_v52 = vld [vmem:[%s3158_s6 + $0x4c8] sm:$0xff]  ;;  %v614_v19 = vld [vmem:[%s3158_s6 + $0x490] sm:$0xff] }
  0x4d   : > { %2535 = vmatprep.subr.mxu1 %v586_v53  ;;  %2501 = vmatpush3.msra.mxu0 %v538_v55  ;;  %v654_v53 = vld [vmem:[%s3158_s6 + $0x5d0] sm:$0xff]  ;;  %v605_v55 = vld [vmem:[%s3158_s6 + $0x448] sm:$0xff] }
  0x4e   : > { %2536 = vmatpush3.msra.mxu1 %v570_v56  ;;  %2502 = vmatprep.subr.mxu0 %v553_v57  ;;  %v638_v56 = vld [vmem:[%s3158_s6 + $0x550] sm:$0xff]  ;;  %v620_v57 = vld [vmem:[%s3158_s6 + $0x4c0] sm:$0xff] }
  0x4f   : > { %2537 = vmatprep.subr.mxu1 %v585_v58  ;;  %2503 = vmatpush3.msra.mxu0 %v537_v59  ;;  %v653_v58 = vld [vmem:[%s3158_s6 + $0x5c8] sm:$0xff]  ;;  %v604_v59 = vld [vmem:[%s3158_s6 + $0x440] sm:$0xff]  ;;  %v598_v22 = vld [vmem:[%s3158_s6 + $0x410] sm:$0xff] }
  0x50   : > { %2538 = vmatpush3.msra.mxu1 %v569_v60  ;;  %2504 = vmatprep.subr.mxu0 %v552_v62  ;;  %v637_v60 = vld [vmem:[%s3158_s6 + $0x548] sm:$0xff]  ;;  %v652_v62 = vld [vmem:[%s3158_s6 + $0x5c0] sm:$0xff] }
  0x51   : > { %2539 = vmatprep.subr.mxu1 %v584_v63  ;;  %2505 = vmatpush3.msra.mxu0 %v536_v0  ;;  %v603_v63 = vld [vmem:[%s3158_s6 + $0x438] sm:$0xff]  ;;  %v636_v0 = vld [vmem:[%s3158_s6 + $0x540] sm:$0xff] }
  0x52   : > { %2540 = vmatpush3.msra.mxu1 %v568_v1  ;;  %2506 = vmatprep.subr.mxu0 %v551_v2  ;;  %v618_v1 = vld [vmem:[%s3158_s6 + $0x4b0] sm:$0xff]  ;;  %v651_v2 = vld [vmem:[%s3158_s6 + $0x5b8] sm:$0xff] }
  0x53   : > { %2541 = vmatprep.subr.mxu1 %v583_v3  ;;  %2507 = vmatpush3.msra.mxu0 %v535_v5  ;;  %v602_v3 = vld [vmem:[%s3158_s6 + $0x430] sm:$0xff]  ;;  %v617_v5 = vld [vmem:[%s3158_s6 + $0x4a8] sm:$0xff] }
  0x54   : > { %2542 = vmatpush3.msra.mxu1 %v567_v6  ;;  %2508 = vmatprep.subr.mxu0 %v550_v9  ;;  %v650_v6 = vld [vmem:[%s3158_s6 + $0x5b0] sm:$0xff]  ;;  %v616_v9 = vld [vmem:[%s3158_s6 + $0x4a0] sm:$0xff] }
  0x55   : > { %2543 = vmatprep.subr.mxu1 %v582_v10  ;;  %2509 = vmatpush3.msra.mxu0 %v534_v12  ;;  %v649_v10 = vld [vmem:[%s3158_s6 + $0x5a8] sm:$0xff] }
  0x56   : > { %2544 = vmatpush3.msra.mxu1 %v566_v13  ;;  %2510 = vmatprep.subr.mxu0 %v549_v14  ;;  %v633_v12 = vld [vmem:[%s3158_s6 + $0x528] sm:$0xff]  ;;  %v342_v13 = vadd.s32 1152, %v3201_v42  ;;  %v615_v14 = vld [vmem:[%s3158_s6 + $0x498] sm:$0xff] }
  0x57   : > { %2545 = vmatprep.subr.mxu1 %v581_v15  ;;  %2511 = vmatpush3.msra.mxu0 %v533_v17  ;;  %v648_v15 = vld [vmem:[%s3158_s6 + $0x5a0] sm:$0xff]  ;;  %v599_v17 = vld [vmem:[%s3158_s6 + $0x418] sm:$0xff] }
  0x58   : > { %2376 = vmatprep.mubr.msk.f32.mxu0 %vm406_vm5, %v304_v18  ;;  %2512 = vmatprep.subr.mxu0 %v548_v20  ;;  %v632_v18 = vld [vmem:[%s3158_s6 + $0x520] sm:$0xff]  ;;  %v647_v20 = vld [vmem:[%s3158_s6 + $0x598] sm:$0xff] }
  0x59   : > { %2546 = vmatpush3.msra.mxu1 %v565_v21  ;;  %2513 = vmatpush3.msra.mxu0 %v532_v23  ;;  %v344_v21 = vadd.s32 1408, %v3201_v42  ;;  %v631_v23 = vld [vmem:[%s3158_s6 + $0x518] sm:$0xff] }
  0x5a   : > { %2547 = vmatprep.subr.mxu1 %v580_v24  ;;  %2377 = vmatmul.mubr.msk.f32.vlgmr.msra.gmra.mxu0 %vm405_vm6, %v303_v25  ;;  %v377_v24 = vadd.s32 %v3215_v54, %v342_v13  ;;  %v343_v25 = vadd.s32 1280, %v3201_v42  ;;  %v667_v13 = vld [vmem:[%s3158_s6 + $0x638] sm:$0xff] }
  0x5b   : > { %2552 = vmatprep.subr.mxu0 %v627_v26  ;;  %2548 = vmatpush3.msra.mxu1 %v564_v27  ;;  %v613_v26 = vld [vmem:[%s3158_s6 + $0x488] sm:$0xff]  ;;  %v646_v27 = vld [vmem:[%s3158_s6 + $0x590] sm:$0xff] }
  0x5c   : > { %2378 = vmatprep.mubr.msk.f32.mxu1 %vm408_vm7, %v306_v28  ;;  %2553 = vmatpush3.msra.mxu0 %v611_v29  ;;  %v376_v28 = vadd.s32 %v3215_v54, %v341_v16  ;;  %v597_v29 = vld [vmem:[%s3158_s6 + $0x408] sm:$0xff]  ;;  %vm410_vm9 = vcmp.lt.s32.totalorder %v377_v24, 16641  ;;  %v715_v16 = vld [vmem:[%s3158_s6 + $0x7b8] sm:$0xff] }
  0x5d   : > { %2379 = vmatmul.mubr.msk.f32.vlgmr.msra.gmra.mxu1 %vm407_vm8, %v305_v30  ;;  %2554 = vmatprep.subr.mxu0 %v626_v31  ;;  %v630_v30 = vld [vmem:[%s3158_s6 + $0x510] sm:$0xff]  ;;  %v612_v31 = vld [vmem:[%s3158_s6 + $0x480] sm:$0xff]  ;;  %v713_v24 = vld [vmem:[%s3158_s6 + $0x7a8] sm:$0xff] }
  0x5e   : > { %2587 = vmatprep.subr.mxu1 %v659_v32  ;;  %2555 = vmatpush3.msra.mxu0 %v610_v33  ;;  %v645_v32 = vld [vmem:[%s3158_s6 + $0x588] sm:$0xff]  ;;  %v379_v33 = vadd.s32 %v3215_v54, %v344_v21  ;;  %vm409_vm10 = vcmp.lt.s32.totalorder %v376_v28, 16641  ;;  %v679_v28 = vld [vmem:[%s3158_s6 + $0x698] sm:$0xff] }
  0x5f   : > { %2588 = vmatpush3.msra.mxu1 %v643_v34  ;;  %2556 = vmatprep.subr.mxu0 %v625_v35  ;;  %v596_v34 = vld [vmem:[%s3158_s6 + $0x400] sm:$0xff]  ;;  %v308_v35 = vld [vmem:[%s3153_s27 + $0x48] sm:$0xff] }
  0x60   : > { %2589 = vmatprep.subr.mxu1 %v658_v36  ;;  %2557 = vmatpush3.msra.mxu0 %v609_v37  ;;  %v378_v36 = vadd.s32 %v3215_v54, %v343_v25  ;;  %v629_v37 = vld [vmem:[%s3158_s6 + $0x508] sm:$0xff]  ;;  %vm412_vm11 = vcmp.lt.s32.totalorder %v379_v33, 16641  ;;  %v664_v25 = vld [vmem:[%s3158_s6 + $0x620] sm:$0xff]  ;;  %v678_v33 = vld [vmem:[%s3158_s6 + $0x690] sm:$0xff] }
  0x61   : > { %2590 = vmatpush3.msra.mxu1 %v642_v38  ;;  %2558 = vmatprep.subr.mxu0 %v624_v39  ;;  %v307_v38 = vld [vmem:[%s3153_s27 + $0x40] sm:$0xff]  ;;  %v665_v21 = vld [vmem:[%s3158_s6 + $0x628] sm:$0xff] }
  0x62   : > { %2591 = vmatprep.subr.mxu1 %v657_v40  ;;  %2559 = vmatpush3.msra.mxu0 %v608_v41  ;;  %v644_v39 = vld [vmem:[%s3158_s6 + $0x580] sm:$0xff]  ;;  %v691_v40 = vld [vmem:[%s3158_s6 + $0x6f8] sm:$0xff]  ;;  %vm411_vm12 = vcmp.lt.s32.totalorder %v378_v36, 16641  ;;  %v662_v36 = vld [vmem:[%s3158_s6 + $0x610] sm:$0xff] }
  0x63   : > { %2592 = vmatpush3.msra.mxu1 %v641_v43  ;;  %2560 = vmatprep.subr.mxu0 %v623_v44  ;;  %v628_v41 = vld [vmem:[%s3158_s6 + $0x500] sm:$0xff]  ;;  %v310_v43 = vld [vmem:[%s3153_s27 + $0x58] sm:$0xff] }
  0x64   : > { %2593 = vmatprep.subr.mxu1 %v656_v45  ;;  %2561 = vmatpush3.msra.mxu0 %v607_v46  ;;  %v675_v44 = vld [vmem:[%s3158_s6 + $0x678] sm:$0xff]  ;;  %v309_v45 = vld [vmem:[%s3153_s27 + $0x50] sm:$0xff] }
  0x65   : > { %2594 = vmatpush3.msra.mxu1 %v640_v47  ;;  %2562 = vmatprep.subr.mxu0 %v622_v48  ;;  %v690_v46 = vld [vmem:[%s3158_s6 + $0x6f0] sm:$0xff]  ;;  %v723_v47 = vld [vmem:[%s3158_s6 + $0x7f8] sm:$0xff] }
  0x66   : > { %2595 = vmatprep.subr.mxu1 %v655_v49  ;;  %2563 = vmatpush3.msra.mxu0 %v606_v50  ;;  %v674_v48 = vld [vmem:[%s3158_s6 + $0x670] sm:$0xff]  ;;  %v707_v49 = vld [vmem:[%s3158_s6 + $0x778] sm:$0xff]  ;;  %v689_v50 = vld [vmem:[%s3158_s6 + $0x6e8] sm:$0xff] }
  0x67   : > { %2596 = vmatpush3.msra.mxu1 %v639_v51  ;;  %2564 = vmatprep.subr.mxu0 %v621_v52  ;;  %v722_v51 = vld [vmem:[%s3158_s6 + $0x7f0] sm:$0xff]  ;;  %v673_v52 = vld [vmem:[%s3158_s6 + $0x668] sm:$0xff] }
  0x68   : > { %2597 = vmatprep.subr.mxu1 %v654_v53  ;;  %2565 = vmatpush3.msra.mxu0 %v605_v55  ;;  %v706_v53 = vld [vmem:[%s3158_s6 + $0x770] sm:$0xff]  ;;  %v688_v55 = vld [vmem:[%s3158_s6 + $0x6e0] sm:$0xff] }
  0x69   : > { %2598 = vmatpush3.msra.mxu1 %v638_v56  ;;  %2566 = vmatprep.subr.mxu0 %v620_v57  ;;  %v721_v56 = vld [vmem:[%s3158_s6 + $0x7e8] sm:$0xff]  ;;  %v672_v57 = vld [vmem:[%s3158_s6 + $0x660] sm:$0xff] }
  0x6a   : > { %2599 = vmatprep.subr.mxu1 %v653_v58  ;;  %2567 = vmatpush3.msra.mxu0 %v604_v59  ;;  %v705_v58 = vld [vmem:[%s3158_s6 + $0x768] sm:$0xff]  ;;  %v687_v59 = vld [vmem:[%s3158_s6 + $0x6d8] sm:$0xff] }
  0x6b   : > { %2600 = vmatpush3.msra.mxu1 %v637_v60  ;;  %2568 = vmatprep.subr.mxu0 %v619_v61  ;;  %v720_v60 = vld [vmem:[%s3158_s6 + $0x7e0] sm:$0xff]  ;;  %v671_v61 = vld [vmem:[%s3158_s6 + $0x658] sm:$0xff] }
  0x6c   : > { %2601 = vmatprep.subr.mxu1 %v652_v62  ;;  %2569 = vmatpush3.msra.mxu0 %v603_v63  ;;  %v704_v62 = vld [vmem:[%s3158_s6 + $0x760] sm:$0xff]  ;;  %v686_v63 = vld [vmem:[%s3158_s6 + $0x6d0] sm:$0xff] }
  0x6d   : > { %2602 = vmatpush3.msra.mxu1 %v636_v0  ;;  %2570 = vmatprep.subr.mxu0 %v618_v1  ;;  %v719_v0 = vld [vmem:[%s3158_s6 + $0x7d8] sm:$0xff]  ;;  %v670_v1 = vld [vmem:[%s3158_s6 + $0x650] sm:$0xff] }
  0x6e   : > { %2603 = vmatprep.subr.mxu1 %v651_v2  ;;  %2571 = vmatpush3.msra.mxu0 %v602_v3  ;;  %v703_v2 = vld [vmem:[%s3158_s6 + $0x758] sm:$0xff]  ;;  %v685_v3 = vld [vmem:[%s3158_s6 + $0x6c8] sm:$0xff] }
  0x6f   : > { %2604 = vmatpush3.msra.mxu1 %v635_v4  ;;  %2572 = vmatprep.subr.mxu0 %v617_v5  ;;  %v718_v4 = vld [vmem:[%s3158_s6 + $0x7d0] sm:$0xff]  ;;  %v669_v5 = vld [vmem:[%s3158_s6 + $0x648] sm:$0xff] }
  0x70   : > { %2605 = vmatprep.subr.mxu1 %v650_v6  ;;  %2573 = vmatpush3.msra.mxu0 %v601_v7  ;;  %v702_v6 = vld [vmem:[%s3158_s6 + $0x750] sm:$0xff]  ;;  %v684_v7 = vld [vmem:[%s3158_s6 + $0x6c0] sm:$0xff] }
  0x71   : > { %2606 = vmatpush3.msra.mxu1 %v634_v8  ;;  %2574 = vmatprep.subr.mxu0 %v616_v9  ;;  %v717_v8 = vld [vmem:[%s3158_s6 + $0x7c8] sm:$0xff]  ;;  %v668_v9 = vld [vmem:[%s3158_s6 + $0x640] sm:$0xff] }
  0x72   : > { %2607 = vmatprep.subr.mxu1 %v649_v10  ;;  %2575 = vmatpush3.msra.mxu0 %v600_v11  ;;  %v701_v10 = vld [vmem:[%s3158_s6 + $0x748] sm:$0xff]  ;;  %v683_v11 = vld [vmem:[%s3158_s6 + $0x6b8] sm:$0xff] }
  0x73   : > { %2608 = vmatpush3.msra.mxu1 %v633_v12  ;;  %2576 = vmatprep.subr.mxu0 %v615_v14  ;;  %v716_v12 = vld [vmem:[%s3158_s6 + $0x7c0] sm:$0xff] }
  0x74   : > { %2609 = vmatprep.subr.mxu1 %v648_v15  ;;  %2577 = vmatpush3.msra.mxu0 %v599_v17  ;;  %v700_v14 = vld [vmem:[%s3158_s6 + $0x740] sm:$0xff]  ;;  %v682_v15 = vld [vmem:[%s3158_s6 + $0x6b0] sm:$0xff] }
  0x75   : > { %2610 = vmatpush3.msra.mxu1 %v632_v18  ;;  %2578 = vmatprep.subr.mxu0 %v614_v19  ;;  %v666_v17 = vld [vmem:[%s3158_s6 + $0x630] sm:$0xff]  ;;  %v699_v18 = vld [vmem:[%s3158_s6 + $0x738] sm:$0xff]  ;;  %v681_v19 = vld [vmem:[%s3158_s6 + $0x6a8] sm:$0xff] }
  0x76   : > { %2611 = vmatprep.subr.mxu1 %v647_v20  ;;  %2579 = vmatpush3.msra.mxu0 %v598_v22  ;;  %v714_v20 = vld [vmem:[%s3158_s6 + $0x7b0] sm:$0xff] }
  0x77   : > { %2612 = vmatpush3.msra.mxu1 %v631_v23  ;;  %2580 = vmatprep.subr.mxu0 %v613_v26  ;;  %v698_v22 = vld [vmem:[%s3158_s6 + $0x730] sm:$0xff]  ;;  %v680_v23 = vld [vmem:[%s3158_s6 + $0x6a0] sm:$0xff]  ;;  %v697_v26 = vld [vmem:[%s3158_s6 + $0x728] sm:$0xff] }
  0x78   : > { %2613 = vmatprep.subr.mxu1 %v646_v27  ;;  %2581 = vmatpush3.msra.mxu0 %v597_v29  ;;  %v346_v27 = vadd.s32 1664, %v3201_v42  ;;  %v712_v29 = vld [vmem:[%s3158_s6 + $0x7a0] sm:$0xff] }
  0x79   : > { %2614 = vmatpush3.msra.mxu1 %v630_v30  ;;  %2582 = vmatprep.subr.mxu0 %v612_v31  ;;  %v345_v30 = vadd.s32 1536, %v3201_v42  ;;  %v663_v31 = vld [vmem:[%s3158_s6 + $0x618] sm:$0xff] }
  0x7a   : > { %2615 = vmatprep.subr.mxu1 %v645_v32  ;;  %2583 = vmatpush3.msra.mxu0 %v596_v34  ;;  %v696_v32 = vld [vmem:[%s3158_s6 + $0x720] sm:$0xff]  ;;  %v711_v34 = vld [vmem:[%s3158_s6 + $0x798] sm:$0xff] }
  0x7b   : > { %2380 = vmatprep.mubr.msk.f32.mxu0 %vm410_vm9, %v308_v35  ;;  %2616 = vmatpush3.msra.mxu1 %v629_v37  ;;  %v348_v35 = vadd.s32 1920, %v3201_v42  ;;  %v695_v37 = vld [vmem:[%s3158_s6 + $0x718] sm:$0xff] }
  0x7c   : > { %2381 = vmatmul.mubr.msk.f32.vlgmr.msra.gmra.mxu0 %vm409_vm10, %v307_v38  ;;  %2617 = vmatprep.subr.mxu1 %v644_v39  ;;  %v381_v38 = vadd.s32 %v3215_v54, %v346_v27  ;;  %v347_v39 = vadd.s32 1792, %v3201_v42  ;;  %v731_v27 = vld [vmem:[%s3158_s6 + $0x838] sm:$0xff] }
  0x7d   : > { %2622 = vmatprep.subr.mxu0 %v691_v40  ;;  %2618 = vmatpush3.msra.mxu1 %v628_v41  ;;  %v677_v40 = vld [vmem:[%s3158_s6 + $0x688] sm:$0xff]  ;;  %v710_v41 = vld [vmem:[%s3158_s6 + $0x790] sm:$0xff] }
  0x7e   : > { %2382 = vmatprep.mubr.msk.f32.mxu1 %vm412_vm11, %v310_v43  ;;  %2623 = vmatpush3.msra.mxu0 %v675_v44  ;;  %v380_v43 = vadd.s32 %v3215_v54, %v345_v30  ;;  %v661_v44 = vld [vmem:[%s3158_s6 + $0x608] sm:$0xff]  ;;  %vm414_vm13 = vcmp.lt.s32.totalorder %v381_v38, 16641  ;;  %v779_v30 = vld [vmem:[%s3158_s6 + $0x9b8] sm:$0xff] }
  0x7f   : > { %2383 = vmatmul.mubr.msk.f32.vlgmr.msra.gmra.mxu1 %vm411_vm12, %v309_v45  ;;  %2624 = vmatprep.subr.mxu0 %v690_v46  ;;  %v694_v45 = vld [vmem:[%s3158_s6 + $0x710] sm:$0xff]  ;;  %v676_v46 = vld [vmem:[%s3158_s6 + $0x680] sm:$0xff]  ;;  %v777_v38 = vld [vmem:[%s3158_s6 + $0x9a8] sm:$0xff] }
  0x80   : > { %2657 = vmatprep.subr.mxu1 %v723_v47  ;;  %2625 = vmatpush3.msra.mxu0 %v674_v48  ;;  %v709_v47 = vld [vmem:[%s3158_s6 + $0x788] sm:$0xff]  ;;  %v383_v48 = vadd.s32 %v3215_v54, %v348_v35  ;;  %vm413_vm14 = vcmp.lt.s32.totalorder %v380_v43, 16641  ;;  %v743_v43 = vld [vmem:[%s3158_s6 + $0x898] sm:$0xff] }
  0x81   : > { %2658 = vmatpush3.msra.mxu1 %v707_v49  ;;  %2626 = vmatprep.subr.mxu0 %v689_v50  ;;  %v660_v49 = vld [vmem:[%s3158_s6 + $0x600] sm:$0xff]  ;;  %v312_v50 = vld [vmem:[%s3153_s27 + $0x68] sm:$0xff] }
  0x82   : > { %2659 = vmatprep.subr.mxu1 %v722_v51  ;;  %2627 = vmatpush3.msra.mxu0 %v673_v52  ;;  %v382_v51 = vadd.s32 %v3215_v54, %v347_v39  ;;  %v693_v52 = vld [vmem:[%s3158_s6 + $0x708] sm:$0xff]  ;;  %vm416_vm15 = vcmp.lt.s32.totalorder %v383_v48, 16641  ;;  %v728_v39 = vld [vmem:[%s3158_s6 + $0x820] sm:$0xff]  ;;  %v742_v48 = vld [vmem:[%s3158_s6 + $0x890] sm:$0xff] }
  0x83   : > { %2660 = vmatpush3.msra.mxu1 %v706_v53  ;;  %2628 = vmatprep.subr.mxu0 %v688_v55  ;;  %v311_v53 = vld [vmem:[%s3153_s27 + $0x60] sm:$0xff]  ;;  %v729_v35 = vld [vmem:[%s3158_s6 + $0x828] sm:$0xff] }
  0x84   : > { %2661 = vmatprep.subr.mxu1 %v721_v56  ;;  %2629 = vmatpush3.msra.mxu0 %v672_v57  ;;  %v708_v55 = vld [vmem:[%s3158_s6 + $0x780] sm:$0xff]  ;;  %v755_v56 = vld [vmem:[%s3158_s6 + $0x8f8] sm:$0xff]  ;;  %vm415_vm0 = vcmp.lt.s32.totalorder %v382_v51, 16641  ;;  %v726_v51 = vld [vmem:[%s3158_s6 + $0x810] sm:$0xff] }
  0x85   : > { %2662 = vmatpush3.msra.mxu1 %v705_v58  ;;  %2630 = vmatprep.subr.mxu0 %v687_v59  ;;  %v692_v57 = vld [vmem:[%s3158_s6 + $0x700] sm:$0xff]  ;;  %v314_v58 = vld [vmem:[%s3153_s27 + $0x78] sm:$0xff] }
  0x86   : > { %2663 = vmatprep.subr.mxu1 %v720_v60  ;;  %2631 = vmatpush3.msra.mxu0 %v671_v61  ;;  %v739_v59 = vld [vmem:[%s3158_s6 + $0x878] sm:$0xff]  ;;  %v313_v60 = vld [vmem:[%s3153_s27 + $0x70] sm:$0xff] }
  0x87   : > { %2664 = vmatpush3.msra.mxu1 %v704_v62  ;;  %2632 = vmatprep.subr.mxu0 %v686_v63  ;;  %v754_v61 = vld [vmem:[%s3158_s6 + $0x8f0] sm:$0xff]  ;;  %v787_v62 = vld [vmem:[%s3158_s6 + $0x9f8] sm:$0xff] }
  0x88   : > { %2665 = vmatprep.subr.mxu1 %v719_v0  ;;  %2633 = vmatpush3.msra.mxu0 %v670_v1  ;;  %v738_v63 = vld [vmem:[%s3158_s6 + $0x870] sm:$0xff]  ;;  %v771_v0 = vld [vmem:[%s3158_s6 + $0x978] sm:$0xff]  ;;  %v753_v1 = vld [vmem:[%s3158_s6 + $0x8e8] sm:$0xff] }
  0x89   : > { %2666 = vmatpush3.msra.mxu1 %v703_v2  ;;  %2634 = vmatprep.subr.mxu0 %v685_v3  ;;  %v786_v2 = vld [vmem:[%s3158_s6 + $0x9f0] sm:$0xff]  ;;  %v737_v3 = vld [vmem:[%s3158_s6 + $0x868] sm:$0xff] }
  0x8a   : > { %2667 = vmatprep.subr.mxu1 %v718_v4  ;;  %2635 = vmatpush3.msra.mxu0 %v669_v5  ;;  %v770_v4 = vld [vmem:[%s3158_s6 + $0x970] sm:$0xff]  ;;  %v752_v5 = vld [vmem:[%s3158_s6 + $0x8e0] sm:$0xff] }
  0x8b   : > { %2668 = vmatpush3.msra.mxu1 %v702_v6  ;;  %2636 = vmatprep.subr.mxu0 %v684_v7  ;;  %v785_v6 = vld [vmem:[%s3158_s6 + $0x9e8] sm:$0xff]  ;;  %v736_v7 = vld [vmem:[%s3158_s6 + $0x860] sm:$0xff] }
  0x8c   : > { %2669 = vmatprep.subr.mxu1 %v717_v8  ;;  %2637 = vmatpush3.msra.mxu0 %v668_v9  ;;  %v769_v8 = vld [vmem:[%s3158_s6 + $0x968] sm:$0xff]  ;;  %v751_v9 = vld [vmem:[%s3158_s6 + $0x8d8] sm:$0xff] }
  0x8d   : > { %2670 = vmatpush3.msra.mxu1 %v701_v10  ;;  %2638 = vmatprep.subr.mxu0 %v683_v11  ;;  %v784_v10 = vld [vmem:[%s3158_s6 + $0x9e0] sm:$0xff]  ;;  %v735_v11 = vld [vmem:[%s3158_s6 + $0x858] sm:$0xff] }
  0x8e   : > { %2671 = vmatprep.subr.mxu1 %v716_v12  ;;  %2639 = vmatpush3.msra.mxu0 %v667_v13  ;;  %v768_v12 = vld [vmem:[%s3158_s6 + $0x960] sm:$0xff]  ;;  %v750_v13 = vld [vmem:[%s3158_s6 + $0x8d0] sm:$0xff] }
  0x8f   : > { %2672 = vmatpush3.msra.mxu1 %v700_v14  ;;  %2640 = vmatprep.subr.mxu0 %v682_v15  ;;  %v783_v14 = vld [vmem:[%s3158_s6 + $0x9d8] sm:$0xff]  ;;  %v734_v15 = vld [vmem:[%s3158_s6 + $0x850] sm:$0xff] }
  0x90   : > { %2673 = vmatprep.subr.mxu1 %v715_v16  ;;  %2641 = vmatpush3.msra.mxu0 %v666_v17  ;;  %v767_v16 = vld [vmem:[%s3158_s6 + $0x958] sm:$0xff]  ;;  %v749_v17 = vld [vmem:[%s3158_s6 + $0x8c8] sm:$0xff] }
  0x91   : > { %2674 = vmatpush3.msra.mxu1 %v699_v18  ;;  %2642 = vmatprep.subr.mxu0 %v681_v19  ;;  %v782_v18 = vld [vmem:[%s3158_s6 + $0x9d0] sm:$0xff]  ;;  %v733_v19 = vld [vmem:[%s3158_s6 + $0x848] sm:$0xff] }
  0x92   : > { %2675 = vmatprep.subr.mxu1 %v714_v20  ;;  %2643 = vmatpush3.msra.mxu0 %v665_v21  ;;  %v766_v20 = vld [vmem:[%s3158_s6 + $0x950] sm:$0xff]  ;;  %v748_v21 = vld [vmem:[%s3158_s6 + $0x8c0] sm:$0xff] }
  0x93   : > { %2676 = vmatpush3.msra.mxu1 %v698_v22  ;;  %2644 = vmatprep.subr.mxu0 %v680_v23  ;;  %v781_v22 = vld [vmem:[%s3158_s6 + $0x9c8] sm:$0xff]  ;;  %v732_v23 = vld [vmem:[%s3158_s6 + $0x840] sm:$0xff] }
  0x94   : > { %2677 = vmatprep.subr.mxu1 %v713_v24  ;;  %2645 = vmatpush3.msra.mxu0 %v664_v25  ;;  %v765_v24 = vld [vmem:[%s3158_s6 + $0x948] sm:$0xff]  ;;  %v747_v25 = vld [vmem:[%s3158_s6 + $0x8b8] sm:$0xff] }
  0x95   : > { %2678 = vmatpush3.msra.mxu1 %v697_v26  ;;  %2646 = vmatprep.subr.mxu0 %v679_v28  ;;  %v780_v26 = vld [vmem:[%s3158_s6 + $0x9c0] sm:$0xff] }
  0x96   : > { %2679 = vmatprep.subr.mxu1 %v712_v29  ;;  %2647 = vmatpush3.msra.mxu0 %v663_v31  ;;  %v764_v28 = vld [vmem:[%s3158_s6 + $0x940] sm:$0xff]  ;;  %v746_v29 = vld [vmem:[%s3158_s6 + $0x8b0] sm:$0xff] }
  0x97   : > { %2680 = vmatpush3.msra.mxu1 %v696_v32  ;;  %2648 = vmatprep.subr.mxu0 %v678_v33  ;;  %v730_v31 = vld [vmem:[%s3158_s6 + $0x830] sm:$0xff]  ;;  %v763_v32 = vld [vmem:[%s3158_s6 + $0x938] sm:$0xff]  ;;  %v745_v33 = vld [vmem:[%s3158_s6 + $0x8a8] sm:$0xff] }
  0x98   : > { %2681 = vmatprep.subr.mxu1 %v711_v34  ;;  %2649 = vmatpush3.msra.mxu0 %v662_v36  ;;  %v778_v34 = vld [vmem:[%s3158_s6 + $0x9b0] sm:$0xff] }
  0x99   : > { %2682 = vmatpush3.msra.mxu1 %v695_v37  ;;  %2650 = vmatprep.subr.mxu0 %v677_v40  ;;  %v762_v36 = vld [vmem:[%s3158_s6 + $0x930] sm:$0xff]  ;;  %v744_v37 = vld [vmem:[%s3158_s6 + $0x8a0] sm:$0xff]  ;;  %v761_v40 = vld [vmem:[%s3158_s6 + $0x928] sm:$0xff] }
  0x9a   : > { %2683 = vmatprep.subr.mxu1 %v710_v41  ;;  %2651 = vmatpush3.msra.mxu0 %v661_v44  ;;  %v350_v41 = vadd.s32 2176, %v3201_v42  ;;  %v776_v44 = vld [vmem:[%s3158_s6 + $0x9a0] sm:$0xff] }
  0x9b   : > { %2684 = vmatpush3.msra.mxu1 %v694_v45  ;;  %2652 = vmatprep.subr.mxu0 %v676_v46  ;;  %v349_v45 = vadd.s32 2048, %v3201_v42  ;;  %v727_v46 = vld [vmem:[%s3158_s6 + $0x818] sm:$0xff] }
  0x9c   : > { %2685 = vmatprep.subr.mxu1 %v709_v47  ;;  %2653 = vmatpush3.msra.mxu0 %v660_v49  ;;  %v760_v47 = vld [vmem:[%s3158_s6 + $0x920] sm:$0xff]  ;;  %v775_v49 = vld [vmem:[%s3158_s6 + $0x998] sm:$0xff] }
  0x9d   : > { %2384 = vmatprep.mubr.msk.f32.mxu0 %vm414_vm13, %v312_v50  ;;  %2686 = vmatpush3.msra.mxu1 %v693_v52  ;;  %v352_v50 = vadd.s32 2432, %v3201_v42  ;;  %v759_v52 = vld [vmem:[%s3158_s6 + $0x918] sm:$0xff] }
  0x9e   : > { %2385 = vmatmul.mubr.msk.f32.vlgmr.msra.gmra.mxu0 %vm413_vm14, %v311_v53  ;;  %2687 = vmatprep.subr.mxu1 %v708_v55  ;;  %v385_v53 = vadd.s32 %v3215_v54, %v350_v41  ;;  %v351_v55 = vadd.s32 2304, %v3201_v42  ;;  %v795_v41 = vld [vmem:[%s3158_s6 + $0xa38] sm:$0xff] }
  0x9f   : > { %2692 = vmatprep.subr.mxu0 %v755_v56  ;;  %2688 = vmatpush3.msra.mxu1 %v692_v57  ;;  %v741_v56 = vld [vmem:[%s3158_s6 + $0x888] sm:$0xff]  ;;  %v774_v57 = vld [vmem:[%s3158_s6 + $0x990] sm:$0xff] }
  0xa0   : > { %2386 = vmatprep.mubr.msk.f32.mxu1 %vm416_vm15, %v314_v58  ;;  %2693 = vmatpush3.msra.mxu0 %v739_v59  ;;  %v384_v58 = vadd.s32 %v3215_v54, %v349_v45  ;;  %v725_v59 = vld [vmem:[%s3158_s6 + $0x808] sm:$0xff]  ;;  %vm418_vm1 = vcmp.lt.s32.totalorder %v385_v53, 16641  ;;  %v843_v45 = vld [vmem:[%s3158_s6 + $0xbb8] sm:$0xff] }
  0xa1   : > { %2387 = vmatmul.mubr.msk.f32.vlgmr.msra.gmra.mxu1 %vm415_vm0, %v313_v60  ;;  %2694 = vmatprep.subr.mxu0 %v754_v61  ;;  %v758_v60 = vld [vmem:[%s3158_s6 + $0x910] sm:$0xff]  ;;  %v740_v61 = vld [vmem:[%s3158_s6 + $0x880] sm:$0xff]  ;;  %v841_v53 = vld [vmem:[%s3158_s6 + $0xba8] sm:$0xff] }
  0xa2   : > { %2727 = vmatprep.subr.mxu1 %v787_v62  ;;  %2695 = vmatpush3.msra.mxu0 %v738_v63  ;;  %v773_v62 = vld [vmem:[%s3158_s6 + $0x988] sm:$0xff]  ;;  %v387_v63 = vadd.s32 %v3215_v54, %v352_v50  ;;  %vm417_vm2 = vcmp.lt.s32.totalorder %v384_v58, 16641  ;;  %v807_v58 = vld [vmem:[%s3158_s6 + $0xa98] sm:$0xff] }
  0xa3   : > { %2728 = vmatpush3.msra.mxu1 %v771_v0  ;;  %2696 = vmatprep.subr.mxu0 %v753_v1  ;;  %v724_v0 = vld [vmem:[%s3158_s6 + $0x800] sm:$0xff]  ;;  %v316_v1 = vld [vmem:[%s3153_s27 + $0x88] sm:$0xff] }
  0xa4   : > { %2729 = vmatprep.subr.mxu1 %v786_v2  ;;  %2697 = vmatpush3.msra.mxu0 %v737_v3  ;;  %v386_v2 = vadd.s32 %v3215_v54, %v351_v55  ;;  %v757_v3 = vld [vmem:[%s3158_s6 + $0x908] sm:$0xff]  ;;  %vm420_vm3 = vcmp.lt.s32.totalorder %v387_v63, 16641  ;;  %v792_v55 = vld [vmem:[%s3158_s6 + $0xa20] sm:$0xff]  ;;  %v806_v63 = vld [vmem:[%s3158_s6 + $0xa90] sm:$0xff] }
  0xa5   : > { %2730 = vmatpush3.msra.mxu1 %v770_v4  ;;  %2698 = vmatprep.subr.mxu0 %v752_v5  ;;  %v315_v4 = vld [vmem:[%s3153_s27 + $0x80] sm:$0xff]  ;;  %v793_v50 = vld [vmem:[%s3158_s6 + $0xa28] sm:$0xff] }
  0xa6   : > { %2731 = vmatprep.subr.mxu1 %v785_v6  ;;  %2699 = vmatpush3.msra.mxu0 %v736_v7  ;;  %v772_v5 = vld [vmem:[%s3158_s6 + $0x980] sm:$0xff]  ;;  %v819_v6 = vld [vmem:[%s3158_s6 + $0xaf8] sm:$0xff]  ;;  %vm419_vm4 = vcmp.lt.s32.totalorder %v386_v2, 16641  ;;  %v790_v2 = vld [vmem:[%s3158_s6 + $0xa10] sm:$0xff] }
  0xa7   : > { %2732 = vmatpush3.msra.mxu1 %v769_v8  ;;  %2700 = vmatprep.subr.mxu0 %v751_v9  ;;  %v756_v7 = vld [vmem:[%s3158_s6 + $0x900] sm:$0xff]  ;;  %v318_v8 = vld [vmem:[%s3153_s27 + $0x98] sm:$0xff] }
  0xa8   : > { %2733 = vmatprep.subr.mxu1 %v784_v10  ;;  %2701 = vmatpush3.msra.mxu0 %v735_v11  ;;  %v803_v9 = vld [vmem:[%s3158_s6 + $0xa78] sm:$0xff]  ;;  %v317_v10 = vld [vmem:[%s3153_s27 + $0x90] sm:$0xff] }
  0xa9   : > { %2734 = vmatpush3.msra.mxu1 %v768_v12  ;;  %2702 = vmatprep.subr.mxu0 %v750_v13  ;;  %v818_v11 = vld [vmem:[%s3158_s6 + $0xaf0] sm:$0xff]  ;;  %v851_v12 = vld [vmem:[%s3158_s6 + $0xbf8] sm:$0xff] }
  0xaa   : > { %2735 = vmatprep.subr.mxu1 %v783_v14  ;;  %2703 = vmatpush3.msra.mxu0 %v734_v15  ;;  %v802_v13 = vld [vmem:[%s3158_s6 + $0xa70] sm:$0xff]  ;;  %v835_v14 = vld [vmem:[%s3158_s6 + $0xb78] sm:$0xff]  ;;  %v817_v15 = vld [vmem:[%s3158_s6 + $0xae8] sm:$0xff] }
  0xab   : > { %2736 = vmatpush3.msra.mxu1 %v767_v16  ;;  %2704 = vmatprep.subr.mxu0 %v749_v17  ;;  %v850_v16 = vld [vmem:[%s3158_s6 + $0xbf0] sm:$0xff]  ;;  %v801_v17 = vld [vmem:[%s3158_s6 + $0xa68] sm:$0xff] }
  0xac   : > { %2737 = vmatprep.subr.mxu1 %v782_v18  ;;  %2705 = vmatpush3.msra.mxu0 %v733_v19  ;;  %v834_v18 = vld [vmem:[%s3158_s6 + $0xb70] sm:$0xff]  ;;  %v816_v19 = vld [vmem:[%s3158_s6 + $0xae0] sm:$0xff] }
  0xad   : > { %2738 = vmatpush3.msra.mxu1 %v766_v20  ;;  %2706 = vmatprep.subr.mxu0 %v748_v21  ;;  %v849_v20 = vld [vmem:[%s3158_s6 + $0xbe8] sm:$0xff]  ;;  %v800_v21 = vld [vmem:[%s3158_s6 + $0xa60] sm:$0xff] }
  0xae   : > { %2739 = vmatprep.subr.mxu1 %v781_v22  ;;  %2707 = vmatpush3.msra.mxu0 %v732_v23  ;;  %v833_v22 = vld [vmem:[%s3158_s6 + $0xb68] sm:$0xff]  ;;  %v815_v23 = vld [vmem:[%s3158_s6 + $0xad8] sm:$0xff] }
  0xaf   : > { %2740 = vmatpush3.msra.mxu1 %v765_v24  ;;  %2708 = vmatprep.subr.mxu0 %v747_v25  ;;  %v848_v24 = vld [vmem:[%s3158_s6 + $0xbe0] sm:$0xff]  ;;  %v799_v25 = vld [vmem:[%s3158_s6 + $0xa58] sm:$0xff] }
  0xb0   : > { %2741 = vmatprep.subr.mxu1 %v780_v26  ;;  %2709 = vmatpush3.msra.mxu0 %v731_v27  ;;  %v832_v26 = vld [vmem:[%s3158_s6 + $0xb60] sm:$0xff]  ;;  %v814_v27 = vld [vmem:[%s3158_s6 + $0xad0] sm:$0xff] }
  0xb1   : > { %2742 = vmatpush3.msra.mxu1 %v764_v28  ;;  %2710 = vmatprep.subr.mxu0 %v746_v29  ;;  %v847_v28 = vld [vmem:[%s3158_s6 + $0xbd8] sm:$0xff]  ;;  %v798_v29 = vld [vmem:[%s3158_s6 + $0xa50] sm:$0xff] }
  0xb2   : > { %2743 = vmatprep.subr.mxu1 %v779_v30  ;;  %2711 = vmatpush3.msra.mxu0 %v730_v31  ;;  %v831_v30 = vld [vmem:[%s3158_s6 + $0xb58] sm:$0xff]  ;;  %v813_v31 = vld [vmem:[%s3158_s6 + $0xac8] sm:$0xff] }
  0xb3   : > { %2744 = vmatpush3.msra.mxu1 %v763_v32  ;;  %2712 = vmatprep.subr.mxu0 %v745_v33  ;;  %v846_v32 = vld [vmem:[%s3158_s6 + $0xbd0] sm:$0xff]  ;;  %v797_v33 = vld [vmem:[%s3158_s6 + $0xa48] sm:$0xff] }
  0xb4   : > { %2745 = vmatprep.subr.mxu1 %v778_v34  ;;  %2713 = vmatpush3.msra.mxu0 %v729_v35  ;;  %v830_v34 = vld [vmem:[%s3158_s6 + $0xb50] sm:$0xff]  ;;  %v812_v35 = vld [vmem:[%s3158_s6 + $0xac0] sm:$0xff] }
  0xb5   : > { %2746 = vmatpush3.msra.mxu1 %v762_v36  ;;  %2714 = vmatprep.subr.mxu0 %v744_v37  ;;  %v845_v36 = vld [vmem:[%s3158_s6 + $0xbc8] sm:$0xff]  ;;  %v796_v37 = vld [vmem:[%s3158_s6 + $0xa40] sm:$0xff] }
  0xb6   : > { %2747 = vmatprep.subr.mxu1 %v777_v38  ;;  %2715 = vmatpush3.msra.mxu0 %v728_v39  ;;  %v829_v38 = vld [vmem:[%s3158_s6 + $0xb48] sm:$0xff]  ;;  %v811_v39 = vld [vmem:[%s3158_s6 + $0xab8] sm:$0xff] }
  0xb7   : > { %2748 = vmatpush3.msra.mxu1 %v761_v40  ;;  %2716 = vmatprep.subr.mxu0 %v743_v43  ;;  %v844_v40 = vld [vmem:[%s3158_s6 + $0xbc0] sm:$0xff] }
  0xb8   : > { %2749 = vmatprep.subr.mxu1 %v776_v44  ;;  %2717 = vmatpush3.msra.mxu0 %v727_v46  ;;  %v828_v43 = vld [vmem:[%s3158_s6 + $0xb40] sm:$0xff]  ;;  %v810_v44 = vld [vmem:[%s3158_s6 + $0xab0] sm:$0xff] }
  0xb9   : > { %2750 = vmatpush3.msra.mxu1 %v760_v47  ;;  %2718 = vmatprep.subr.mxu0 %v742_v48  ;;  %v794_v46 = vld [vmem:[%s3158_s6 + $0xa30] sm:$0xff]  ;;  %v827_v47 = vld [vmem:[%s3158_s6 + $0xb38] sm:$0xff]  ;;  %v809_v48 = vld [vmem:[%s3158_s6 + $0xaa8] sm:$0xff] }
  0xba   : > { %2751 = vmatprep.subr.mxu1 %v775_v49  ;;  %2719 = vmatpush3.msra.mxu0 %v726_v51  ;;  %v842_v49 = vld [vmem:[%s3158_s6 + $0xbb0] sm:$0xff] }
  0xbb   : > { %2752 = vmatpush3.msra.mxu1 %v759_v52  ;;  %2720 = vmatprep.subr.mxu0 %v741_v56  ;;  %v826_v51 = vld [vmem:[%s3158_s6 + $0xb30] sm:$0xff]  ;;  %v808_v52 = vld [vmem:[%s3158_s6 + $0xaa0] sm:$0xff]  ;;  %v825_v56 = vld [vmem:[%s3158_s6 + $0xb28] sm:$0xff] }
  0xbc   : > { %2753 = vmatprep.subr.mxu1 %v774_v57  ;;  %2721 = vmatpush3.msra.mxu0 %v725_v59  ;;  %v354_v57 = vadd.s32 2688, %v3201_v42  ;;  %v840_v59 = vld [vmem:[%s3158_s6 + $0xba0] sm:$0xff] }
  0xbd   : > { %2754 = vmatpush3.msra.mxu1 %v758_v60  ;;  %2722 = vmatprep.subr.mxu0 %v740_v61  ;;  %v353_v60 = vadd.s32 2560, %v3201_v42  ;;  %v791_v61 = vld [vmem:[%s3158_s6 + $0xa18] sm:$0xff] }
  0xbe   : > { %2755 = vmatprep.subr.mxu1 %v773_v62  ;;  %2723 = vmatpush3.msra.mxu0 %v724_v0  ;;  %v824_v62 = vld [vmem:[%s3158_s6 + $0xb20] sm:$0xff]  ;;  %v839_v0 = vld [vmem:[%s3158_s6 + $0xb98] sm:$0xff] }
  0xbf   : > { %2388 = vmatprep.mubr.msk.f32.mxu0 %vm418_vm1, %v316_v1  ;;  %2756 = vmatpush3.msra.mxu1 %v757_v3  ;;  %v356_v1 = vadd.s32 2944, %v3201_v42  ;;  %v823_v3 = vld [vmem:[%s3158_s6 + $0xb18] sm:$0xff]  ;;  %vm3095_vm1 = vmmov 0  }
  0xc0   : > { %2389 = vmatmul.mubr.msk.f32.vlgmr.msra.gmra.mxu0 %vm417_vm2, %v315_v4  ;;  %2757 = vmatprep.subr.mxu1 %v772_v5  ;;  %v389_v4 = vadd.s32 %v3215_v54, %v354_v57  ;;  %v355_v5 = vadd.s32 2816, %v3201_v42  ;;  %v859_v57 = vld [vmem:[%s3158_s6 + $0xc38] sm:$0xff] }
  0xc1   : > { %2762 = vmatprep.subr.mxu0 %v819_v6  ;;  %2758 = vmatpush3.msra.mxu1 %v756_v7  ;;  %v805_v6 = vld [vmem:[%s3158_s6 + $0xa88] sm:$0xff]  ;;  %v838_v7 = vld [vmem:[%s3158_s6 + $0xb90] sm:$0xff] }
  0xc2   : > { %2390 = vmatprep.mubr.msk.f32.mxu1 %vm420_vm3, %v318_v8  ;;  %2763 = vmatpush3.msra.mxu0 %v803_v9  ;;  %v388_v8 = vadd.s32 %v3215_v54, %v353_v60  ;;  %v789_v9 = vld [vmem:[%s3158_s6 + $0xa08] sm:$0xff]  ;;  %vm422_vm5 = vcmp.lt.s32.totalorder %v389_v4, 16641  ;;  %v907_v60 = vld [vmem:[%s3158_s6 + $0xdb8] sm:$0xff]  ;;  %vm2187_vm3 = vcmask 261120  }
  0xc3   : > { %2391 = vmatmul.mubr.msk.f32.vlgmr.msra.gmra.mxu1 %vm419_vm4, %v317_v10  ;;  %2764 = vmatprep.subr.mxu0 %v818_v11  ;;  %v822_v10 = vld [vmem:[%s3158_s6 + $0xb10] sm:$0xff]  ;;  %v804_v11 = vld [vmem:[%s3158_s6 + $0xa80] sm:$0xff]  ;;  %v905_v4 = vld [vmem:[%s3158_s6 + $0xda8] sm:$0xff] }
  0xc4   : > { %2797 = vmatprep.subr.mxu1 %v851_v12  ;;  %2765 = vmatpush3.msra.mxu0 %v802_v13  ;;  %v837_v12 = vld [vmem:[%s3158_s6 + $0xb88] sm:$0xff]  ;;  %v391_v13 = vadd.s32 %v3215_v54, %v356_v1  ;;  %vm421_vm6 = vcmp.lt.s32.totalorder %v388_v8, 16641  ;;  %v871_v8 = vld [vmem:[%s3158_s6 + $0xc98] sm:$0xff] }
  0xc5   : > { %2798 = vmatpush3.msra.mxu1 %v835_v14  ;;  %2766 = vmatprep.subr.mxu0 %v817_v15  ;;  %v788_v14 = vld [vmem:[%s3158_s6 + $0xa00] sm:$0xff]  ;;  %v320_v15 = vld [vmem:[%s3153_s27 + $0xa8] sm:$0xff] }
  0xc6   : > { %2799 = vmatprep.subr.mxu1 %v850_v16  ;;  %2767 = vmatpush3.msra.mxu0 %v801_v17  ;;  %v390_v16 = vadd.s32 %v3215_v54, %v355_v5  ;;  %v821_v17 = vld [vmem:[%s3158_s6 + $0xb08] sm:$0xff]  ;;  %vm424_vm7 = vcmp.lt.s32.totalorder %v391_v13, 16641  ;;  %v856_v5 = vld [vmem:[%s3158_s6 + $0xc20] sm:$0xff]  ;;  %v870_v13 = vld [vmem:[%s3158_s6 + $0xc90] sm:$0xff] }
  0xc7   : > { %2800 = vmatpush3.msra.mxu1 %v834_v18  ;;  %2768 = vmatprep.subr.mxu0 %v816_v19  ;;  %v319_v18 = vld [vmem:[%s3153_s27 + $0xa0] sm:$0xff]  ;;  %v857_v1 = vld [vmem:[%s3158_s6 + $0xc28] sm:$0xff] }
  0xc8   : > { %2801 = vmatprep.subr.mxu1 %v849_v20  ;;  %2769 = vmatpush3.msra.mxu0 %v800_v21  ;;  %v836_v19 = vld [vmem:[%s3158_s6 + $0xb80] sm:$0xff]  ;;  %v883_v20 = vld [vmem:[%s3158_s6 + $0xcf8] sm:$0xff]  ;;  %vm423_vm8 = vcmp.lt.s32.totalorder %v390_v16, 16641  ;;  %v854_v16 = vld [vmem:[%s3158_s6 + $0xc10] sm:$0xff] }
  0xc9   : > { %2802 = vmatpush3.msra.mxu1 %v833_v22  ;;  %2770 = vmatprep.subr.mxu0 %v815_v23  ;;  %v820_v21 = vld [vmem:[%s3158_s6 + $0xb00] sm:$0xff]  ;;  %v322_v22 = vld [vmem:[%s3153_s27 + $0xb8] sm:$0xff] }
  0xca   : > { %2803 = vmatprep.subr.mxu1 %v848_v24  ;;  %2771 = vmatpush3.msra.mxu0 %v799_v25  ;;  %v867_v23 = vld [vmem:[%s3158_s6 + $0xc78] sm:$0xff]  ;;  %v321_v24 = vld [vmem:[%s3153_s27 + $0xb0] sm:$0xff] }
  0xcb   : > { %2804 = vmatpush3.msra.mxu1 %v832_v26  ;;  %2772 = vmatprep.subr.mxu0 %v814_v27  ;;  %v882_v25 = vld [vmem:[%s3158_s6 + $0xcf0] sm:$0xff]  ;;  %v915_v26 = vld [vmem:[%s3158_s6 + $0xdf8] sm:$0xff] }
  0xcc   : > { %2805 = vmatprep.subr.mxu1 %v847_v28  ;;  %2773 = vmatpush3.msra.mxu0 %v798_v29  ;;  %v866_v27 = vld [vmem:[%s3158_s6 + $0xc70] sm:$0xff]  ;;  %v899_v28 = vld [vmem:[%s3158_s6 + $0xd78] sm:$0xff]  ;;  %v881_v29 = vld [vmem:[%s3158_s6 + $0xce8] sm:$0xff] }
  0xcd   : > { %2806 = vmatpush3.msra.mxu1 %v831_v30  ;;  %2774 = vmatprep.subr.mxu0 %v813_v31  ;;  %v914_v30 = vld [vmem:[%s3158_s6 + $0xdf0] sm:$0xff]  ;;  %v865_v31 = vld [vmem:[%s3158_s6 + $0xc68] sm:$0xff] }
  0xce   : > { %2807 = vmatprep.subr.mxu1 %v846_v32  ;;  %2775 = vmatpush3.msra.mxu0 %v797_v33  ;;  %v898_v32 = vld [vmem:[%s3158_s6 + $0xd70] sm:$0xff]  ;;  %v880_v33 = vld [vmem:[%s3158_s6 + $0xce0] sm:$0xff] }
  0xcf   : > { %2808 = vmatpush3.msra.mxu1 %v830_v34  ;;  %2776 = vmatprep.subr.mxu0 %v812_v35  ;;  %v913_v34 = vld [vmem:[%s3158_s6 + $0xde8] sm:$0xff]  ;;  %v864_v35 = vld [vmem:[%s3158_s6 + $0xc60] sm:$0xff] }
  0xd0   : > { %2809 = vmatprep.subr.mxu1 %v845_v36  ;;  %2777 = vmatpush3.msra.mxu0 %v796_v37  ;;  %v897_v36 = vld [vmem:[%s3158_s6 + $0xd68] sm:$0xff]  ;;  %v879_v37 = vld [vmem:[%s3158_s6 + $0xcd8] sm:$0xff] }
  0xd1   : > { %2810 = vmatpush3.msra.mxu1 %v829_v38  ;;  %2778 = vmatprep.subr.mxu0 %v811_v39  ;;  %v912_v38 = vld [vmem:[%s3158_s6 + $0xde0] sm:$0xff]  ;;  %v863_v39 = vld [vmem:[%s3158_s6 + $0xc58] sm:$0xff] }
  0xd2   : > { %2811 = vmatprep.subr.mxu1 %v844_v40  ;;  %2779 = vmatpush3.msra.mxu0 %v795_v41  ;;  %v896_v40 = vld [vmem:[%s3158_s6 + $0xd60] sm:$0xff]  ;;  %v878_v41 = vld [vmem:[%s3158_s6 + $0xcd0] sm:$0xff] }
  0xd3   : > { %2812 = vmatpush3.msra.mxu1 %v828_v43  ;;  %2780 = vmatprep.subr.mxu0 %v810_v44  ;;  %v911_v43 = vld [vmem:[%s3158_s6 + $0xdd8] sm:$0xff]  ;;  %v862_v44 = vld [vmem:[%s3158_s6 + $0xc50] sm:$0xff] }
  0xd4   : > { %2813 = vmatprep.subr.mxu1 %v843_v45  ;;  %2781 = vmatpush3.msra.mxu0 %v794_v46  ;;  %v895_v45 = vld [vmem:[%s3158_s6 + $0xd58] sm:$0xff]  ;;  %v877_v46 = vld [vmem:[%s3158_s6 + $0xcc8] sm:$0xff] }
  0xd5   : > { %2814 = vmatpush3.msra.mxu1 %v827_v47  ;;  %2782 = vmatprep.subr.mxu0 %v809_v48  ;;  %v910_v47 = vld [vmem:[%s3158_s6 + $0xdd0] sm:$0xff]  ;;  %v861_v48 = vld [vmem:[%s3158_s6 + $0xc48] sm:$0xff] }
  0xd6   : > { %2815 = vmatprep.subr.mxu1 %v842_v49  ;;  %2783 = vmatpush3.msra.mxu0 %v793_v50  ;;  %v894_v49 = vld [vmem:[%s3158_s6 + $0xd50] sm:$0xff]  ;;  %v876_v50 = vld [vmem:[%s3158_s6 + $0xcc0] sm:$0xff] }
  0xd7   : > { %2816 = vmatpush3.msra.mxu1 %v826_v51  ;;  %2784 = vmatprep.subr.mxu0 %v808_v52  ;;  %v909_v51 = vld [vmem:[%s3158_s6 + $0xdc8] sm:$0xff]  ;;  %v860_v52 = vld [vmem:[%s3158_s6 + $0xc40] sm:$0xff] }
  0xd8   : > { %2817 = vmatprep.subr.mxu1 %v841_v53  ;;  %2785 = vmatpush3.msra.mxu0 %v792_v55  ;;  %v893_v53 = vld [vmem:[%s3158_s6 + $0xd48] sm:$0xff]  ;;  %v875_v55 = vld [vmem:[%s3158_s6 + $0xcb8] sm:$0xff] }
  0xd9   : > { %2818 = vmatpush3.msra.mxu1 %v825_v56  ;;  %2786 = vmatprep.subr.mxu0 %v807_v58  ;;  %v908_v56 = vld [vmem:[%s3158_s6 + $0xdc0] sm:$0xff] }
  0xda   : > { %2819 = vmatprep.subr.mxu1 %v840_v59  ;;  %2787 = vmatpush3.msra.mxu0 %v791_v61  ;;  %v892_v58 = vld [vmem:[%s3158_s6 + $0xd40] sm:$0xff]  ;;  %v874_v59 = vld [vmem:[%s3158_s6 + $0xcb0] sm:$0xff] }
  0xdb   : > { %2820 = vmatpush3.msra.mxu1 %v824_v62  ;;  %2788 = vmatprep.subr.mxu0 %v806_v63  ;;  %v858_v61 = vld [vmem:[%s3158_s6 + $0xc30] sm:$0xff]  ;;  %v891_v62 = vld [vmem:[%s3158_s6 + $0xd38] sm:$0xff]  ;;  %v873_v63 = vld [vmem:[%s3158_s6 + $0xca8] sm:$0xff] }
  0xdc   : > { %2821 = vmatprep.subr.mxu1 %v839_v0  ;;  %2789 = vmatpush3.msra.mxu0 %v790_v2  ;;  %v906_v0 = vld [vmem:[%s3158_s6 + $0xdb0] sm:$0xff] }
  0xdd   : > { %2822 = vmatpush3.msra.mxu1 %v823_v3  ;;  %2790 = vmatprep.subr.mxu0 %v805_v6  ;;  %v890_v2 = vld [vmem:[%s3158_s6 + $0xd30] sm:$0xff]  ;;  %v872_v3 = vld [vmem:[%s3158_s6 + $0xca0] sm:$0xff]  ;;  %v889_v6 = vld [vmem:[%s3158_s6 + $0xd28] sm:$0xff] }
  0xde   : > { %2823 = vmatprep.subr.mxu1 %v838_v7  ;;  %2791 = vmatpush3.msra.mxu0 %v789_v9  ;;  %v358_v7 = vadd.s32 3200, %v3201_v42  ;;  %v904_v9 = vld [vmem:[%s3158_s6 + $0xda0] sm:$0xff] }
  0xdf   : > { %2824 = vmatpush3.msra.mxu1 %v822_v10  ;;  %2792 = vmatprep.subr.mxu0 %v804_v11  ;;  %v357_v10 = vadd.s32 3072, %v3201_v42  ;;  %v855_v11 = vld [vmem:[%s3158_s6 + $0xc18] sm:$0xff] }
  0xe0   : > { %2825 = vmatprep.subr.mxu1 %v837_v12  ;;  %2793 = vmatpush3.msra.mxu0 %v788_v14  ;;  %v888_v12 = vld [vmem:[%s3158_s6 + $0xd20] sm:$0xff]  ;;  %v903_v14 = vld [vmem:[%s3158_s6 + $0xd98] sm:$0xff] }
  0xe1   : > { %2392 = vmatprep.mubr.msk.f32.mxu0 %vm422_vm5, %v320_v15  ;;  %2826 = vmatpush3.msra.mxu1 %v821_v17  ;;  %v360_v15 = vadd.s32 3456, %v3201_v42  ;;  %v887_v17 = vld [vmem:[%s3158_s6 + $0xd18] sm:$0xff] }
  0xe2   : > { %2393 = vmatmul.mubr.msk.f32.vlgmr.msra.gmra.mxu0 %vm421_vm6, %v319_v18  ;;  %2827 = vmatprep.subr.mxu1 %v836_v19  ;;  %v393_v18 = vadd.s32 %v3215_v54, %v358_v7  ;;  %v359_v19 = vadd.s32 3328, %v3201_v42  ;;  %v923_v7 = vld [vmem:[%s3158_s6 + $0xe38] sm:$0xff] }
  0xe3   : > { %2832 = vmatprep.subr.mxu0 %v883_v20  ;;  %2828 = vmatpush3.msra.mxu1 %v820_v21  ;;  %v869_v20 = vld [vmem:[%s3158_s6 + $0xc88] sm:$0xff]  ;;  %v902_v21 = vld [vmem:[%s3158_s6 + $0xd90] sm:$0xff] }
  0xe4   : > { %2394 = vmatprep.mubr.msk.f32.mxu1 %vm424_vm7, %v322_v22  ;;  %2833 = vmatpush3.msra.mxu0 %v867_v23  ;;  %v392_v22 = vadd.s32 %v3215_v54, %v357_v10  ;;  %v853_v23 = vld [vmem:[%s3158_s6 + $0xc08] sm:$0xff]  ;;  %vm426_vm9 = vcmp.lt.s32.totalorder %v393_v18, 16641  ;;  %v971_v10 = vld [vmem:[%s3158_s6 + $0xfb8] sm:$0xff] }
  0xe5   : > { %2395 = vmatmul.mubr.msk.f32.vlgmr.msra.gmra.mxu1 %vm423_vm8, %v321_v24  ;;  %2834 = vmatprep.subr.mxu0 %v882_v25  ;;  %v886_v24 = vld [vmem:[%s3158_s6 + $0xd10] sm:$0xff]  ;;  %v868_v25 = vld [vmem:[%s3158_s6 + $0xc80] sm:$0xff]  ;;  %v969_v18 = vld [vmem:[%s3158_s6 + $0xfa8] sm:$0xff] }
  0xe6   : > { %2867 = vmatprep.subr.mxu1 %v915_v26  ;;  %2835 = vmatpush3.msra.mxu0 %v866_v27  ;;  %v901_v26 = vld [vmem:[%s3158_s6 + $0xd88] sm:$0xff]  ;;  %v395_v27 = vadd.s32 %v3215_v54, %v360_v15  ;;  %vm425_vm10 = vcmp.lt.s32.totalorder %v392_v22, 16641  ;;  %v935_v22 = vld [vmem:[%s3158_s6 + $0xe98] sm:$0xff] }
  0xe7   : > { %2868 = vmatpush3.msra.mxu1 %v899_v28  ;;  %2836 = vmatprep.subr.mxu0 %v881_v29  ;;  %v852_v28 = vld [vmem:[%s3158_s6 + $0xc00] sm:$0xff]  ;;  %v324_v29 = vld [vmem:[%s3153_s27 + $0xc8] sm:$0xff] }
  0xe8   : > { %2869 = vmatprep.subr.mxu1 %v914_v30  ;;  %2837 = vmatpush3.msra.mxu0 %v865_v31  ;;  %v394_v30 = vadd.s32 %v3215_v54, %v359_v19  ;;  %v885_v31 = vld [vmem:[%s3158_s6 + $0xd08] sm:$0xff]  ;;  %vm428_vm11 = vcmp.lt.s32.totalorder %v395_v27, 16641  ;;  %v920_v19 = vld [vmem:[%s3158_s6 + $0xe20] sm:$0xff]  ;;  %v934_v27 = vld [vmem:[%s3158_s6 + $0xe90] sm:$0xff] }
  0xe9   : > { %2870 = vmatpush3.msra.mxu1 %v898_v32  ;;  %2838 = vmatprep.subr.mxu0 %v880_v33  ;;  %v323_v32 = vld [vmem:[%s3153_s27 + $0xc0] sm:$0xff]  ;;  %v921_v15 = vld [vmem:[%s3158_s6 + $0xe28] sm:$0xff] }
  0xea   : > { %2871 = vmatprep.subr.mxu1 %v913_v34  ;;  %2839 = vmatpush3.msra.mxu0 %v864_v35  ;;  %v900_v33 = vld [vmem:[%s3158_s6 + $0xd80] sm:$0xff]  ;;  %v947_v34 = vld [vmem:[%s3158_s6 + $0xef8] sm:$0xff]  ;;  %vm427_vm12 = vcmp.lt.s32.totalorder %v394_v30, 16641  ;;  %v918_v30 = vld [vmem:[%s3158_s6 + $0xe10] sm:$0xff] }
  0xeb   : > { %2872 = vmatpush3.msra.mxu1 %v897_v36  ;;  %2840 = vmatprep.subr.mxu0 %v879_v37  ;;  %v884_v35 = vld [vmem:[%s3158_s6 + $0xd00] sm:$0xff]  ;;  %v326_v36 = vld [vmem:[%s3153_s27 + $0xd8] sm:$0xff] }
  0xec   : > { %2873 = vmatprep.subr.mxu1 %v912_v38  ;;  %2841 = vmatpush3.msra.mxu0 %v863_v39  ;;  %v931_v37 = vld [vmem:[%s3158_s6 + $0xe78] sm:$0xff]  ;;  %v325_v38 = vld [vmem:[%s3153_s27 + $0xd0] sm:$0xff] }
  0xed   : > { %2874 = vmatpush3.msra.mxu1 %v896_v40  ;;  %2842 = vmatprep.subr.mxu0 %v878_v41  ;;  %v946_v39 = vld [vmem:[%s3158_s6 + $0xef0] sm:$0xff]  ;;  %v979_v40 = vld [vmem:[%s3158_s6 + $0xff8] sm:$0xff] }
  0xee   : > { %2875 = vmatprep.subr.mxu1 %v911_v43  ;;  %2843 = vmatpush3.msra.mxu0 %v862_v44  ;;  %v930_v41 = vld [vmem:[%s3158_s6 + $0xe70] sm:$0xff]  ;;  %v963_v43 = vld [vmem:[%s3158_s6 + $0xf78] sm:$0xff]  ;;  %v945_v44 = vld [vmem:[%s3158_s6 + $0xee8] sm:$0xff] }
  0xef   : > { %2876 = vmatpush3.msra.mxu1 %v895_v45  ;;  %2844 = vmatprep.subr.mxu0 %v877_v46  ;;  %v978_v45 = vld [vmem:[%s3158_s6 + $0xff0] sm:$0xff]  ;;  %v929_v46 = vld [vmem:[%s3158_s6 + $0xe68] sm:$0xff] }
  0xf0   : > { %2877 = vmatprep.subr.mxu1 %v910_v47  ;;  %2845 = vmatpush3.msra.mxu0 %v861_v48  ;;  %v962_v47 = vld [vmem:[%s3158_s6 + $0xf70] sm:$0xff]  ;;  %v944_v48 = vld [vmem:[%s3158_s6 + $0xee0] sm:$0xff] }
  0xf1   : > { %2878 = vmatpush3.msra.mxu1 %v894_v49  ;;  %2846 = vmatprep.subr.mxu0 %v876_v50  ;;  %v977_v49 = vld [vmem:[%s3158_s6 + $0xfe8] sm:$0xff]  ;;  %v928_v50 = vld [vmem:[%s3158_s6 + $0xe60] sm:$0xff] }
  0xf2   : > { %2879 = vmatprep.subr.mxu1 %v909_v51  ;;  %2847 = vmatpush3.msra.mxu0 %v860_v52  ;;  %v961_v51 = vld [vmem:[%s3158_s6 + $0xf68] sm:$0xff]  ;;  %v943_v52 = vld [vmem:[%s3158_s6 + $0xed8] sm:$0xff] }
  0xf3   : > { %2880 = vmatpush3.msra.mxu1 %v893_v53  ;;  %2848 = vmatprep.subr.mxu0 %v875_v55  ;;  %v976_v53 = vld [vmem:[%s3158_s6 + $0xfe0] sm:$0xff]  ;;  %v927_v55 = vld [vmem:[%s3158_s6 + $0xe58] sm:$0xff] }
  0xf4   : > { %2881 = vmatprep.subr.mxu1 %v908_v56  ;;  %2849 = vmatpush3.msra.mxu0 %v859_v57  ;;  %v960_v56 = vld [vmem:[%s3158_s6 + $0xf60] sm:$0xff]  ;;  %v942_v57 = vld [vmem:[%s3158_s6 + $0xed0] sm:$0xff] }
  0xf5   : > { %2882 = vmatpush3.msra.mxu1 %v892_v58  ;;  %2850 = vmatprep.subr.mxu0 %v874_v59  ;;  %v975_v58 = vld [vmem:[%s3158_s6 + $0xfd8] sm:$0xff]  ;;  %v926_v59 = vld [vmem:[%s3158_s6 + $0xe50] sm:$0xff] }
  0xf6   : > { %2883 = vmatprep.subr.mxu1 %v907_v60  ;;  %2851 = vmatpush3.msra.mxu0 %v858_v61  ;;  %v959_v60 = vld [vmem:[%s3158_s6 + $0xf58] sm:$0xff]  ;;  %v941_v61 = vld [vmem:[%s3158_s6 + $0xec8] sm:$0xff] }
  0xf7   : > { %2884 = vmatpush3.msra.mxu1 %v891_v62  ;;  %2852 = vmatprep.subr.mxu0 %v873_v63  ;;  %v974_v62 = vld [vmem:[%s3158_s6 + $0xfd0] sm:$0xff]  ;;  %v925_v63 = vld [vmem:[%s3158_s6 + $0xe48] sm:$0xff] }
  0xf8   : > { %2885 = vmatprep.subr.mxu1 %v906_v0  ;;  %2853 = vmatpush3.msra.mxu0 %v857_v1  ;;  %v958_v0 = vld [vmem:[%s3158_s6 + $0xf50] sm:$0xff]  ;;  %v940_v1 = vld [vmem:[%s3158_s6 + $0xec0] sm:$0xff] }
  0xf9   : > { %2886 = vmatpush3.msra.mxu1 %v890_v2  ;;  %2854 = vmatprep.subr.mxu0 %v872_v3  ;;  %v973_v2 = vld [vmem:[%s3158_s6 + $0xfc8] sm:$0xff]  ;;  %v924_v3 = vld [vmem:[%s3158_s6 + $0xe40] sm:$0xff] }
  0xfa   : > { %2887 = vmatprep.subr.mxu1 %v905_v4  ;;  %2855 = vmatpush3.msra.mxu0 %v856_v5  ;;  %v957_v4 = vld [vmem:[%s3158_s6 + $0xf48] sm:$0xff]  ;;  %v939_v5 = vld [vmem:[%s3158_s6 + $0xeb8] sm:$0xff] }
  0xfb   : > { %2888 = vmatpush3.msra.mxu1 %v889_v6  ;;  %2856 = vmatprep.subr.mxu0 %v871_v8  ;;  %v972_v6 = vld [vmem:[%s3158_s6 + $0xfc0] sm:$0xff] }
  0xfc   : > { %2889 = vmatprep.subr.mxu1 %v904_v9  ;;  %2857 = vmatpush3.msra.mxu0 %v855_v11  ;;  %v956_v8 = vld [vmem:[%s3158_s6 + $0xf40] sm:$0xff]  ;;  %v938_v9 = vld [vmem:[%s3158_s6 + $0xeb0] sm:$0xff] }
  0xfd   : > { %2890 = vmatpush3.msra.mxu1 %v888_v12  ;;  %2858 = vmatprep.subr.mxu0 %v870_v13  ;;  %v922_v11 = vld [vmem:[%s3158_s6 + $0xe30] sm:$0xff]  ;;  %v955_v12 = vld [vmem:[%s3158_s6 + $0xf38] sm:$0xff]  ;;  %v937_v13 = vld [vmem:[%s3158_s6 + $0xea8] sm:$0xff] }
  0xfe   : > { %2891 = vmatprep.subr.mxu1 %v903_v14  ;;  %2859 = vmatpush3.msra.mxu0 %v854_v16  ;;  %v970_v14 = vld [vmem:[%s3158_s6 + $0xfb0] sm:$0xff] }
  0xff   : > { %2892 = vmatpush3.msra.mxu1 %v887_v17  ;;  %2860 = vmatprep.subr.mxu0 %v869_v20  ;;  %v954_v16 = vld [vmem:[%s3158_s6 + $0xf30] sm:$0xff]  ;;  %v936_v17 = vld [vmem:[%s3158_s6 + $0xea0] sm:$0xff]  ;;  %v953_v20 = vld [vmem:[%s3158_s6 + $0xf28] sm:$0xff] }
 0x100   : > { %2893 = vmatprep.subr.mxu1 %v902_v21  ;;  %2861 = vmatpush3.msra.mxu0 %v853_v23  ;;  %v362_v21 = vadd.s32 3712, %v3201_v42  ;;  %v968_v23 = vld [vmem:[%s3158_s6 + $0xfa0] sm:$0xff] }
 0x101   : > { %2894 = vmatpush3.msra.mxu1 %v886_v24  ;;  %2862 = vmatprep.subr.mxu0 %v868_v25  ;;  %v361_v24 = vadd.s32 3584, %v3201_v42  ;;  %v919_v25 = vld [vmem:[%s3158_s6 + $0xe18] sm:$0xff] }
 0x102   : > { %2895 = vmatprep.subr.mxu1 %v901_v26  ;;  %2863 = vmatpush3.msra.mxu0 %v852_v28  ;;  %v952_v26 = vld [vmem:[%s3158_s6 + $0xf20] sm:$0xff]  ;;  %v967_v28 = vld [vmem:[%s3158_s6 + $0xf98] sm:$0xff] }
 0x103   : > { %2396 = vmatprep.mubr.msk.f32.mxu0 %vm426_vm9, %v324_v29  ;;  %2896 = vmatpush3.msra.mxu1 %v885_v31  ;;  %v364_v29 = vadd.s32 3968, %v3201_v42  ;;  %v951_v31 = vld [vmem:[%s3158_s6 + $0xf18] sm:$0xff] }
 0x104   : > { %2397 = vmatmul.mubr.msk.f32.vlgmr.msra.gmra.mxu0 %vm425_vm10, %v323_v32  ;;  %2897 = vmatprep.subr.mxu1 %v900_v33  ;;  %v397_v32 = vadd.s32 %v3215_v54, %v362_v21  ;;  %v363_v33 = vadd.s32 3840, %v3201_v42 }
 0x105   : > { %2902 = vmatprep.subr.mxu0 %v947_v34  ;;  %2898 = vmatpush3.msra.mxu1 %v884_v35  ;;  %v933_v34 = vld [vmem:[%s3158_s6 + $0xe88] sm:$0xff]  ;;  %v966_v35 = vld [vmem:[%s3158_s6 + $0xf90] sm:$0xff] }
 0x106   : > { %2398 = vmatprep.mubr.msk.f32.mxu1 %vm428_vm11, %v326_v36  ;;  %2903 = vmatpush3.msra.mxu0 %v931_v37  ;;  %v396_v36 = vadd.s32 %v3215_v54, %v361_v24  ;;  %v917_v37 = vld [vmem:[%s3158_s6 + $0xe08] sm:$0xff]  ;;  %vm430_vm13 = vcmp.lt.s32.totalorder %v397_v32, 16641 }
 0x107   : > { %2399 = vmatmul.mubr.msk.f32.vlgmr.msra.gmra.mxu1 %vm427_vm12, %v325_v38  ;;  %2904 = vmatprep.subr.mxu0 %v946_v39  ;;  %v950_v38 = vld [vmem:[%s3158_s6 + $0xf10] sm:$0xff]  ;;  %v932_v39 = vld [vmem:[%s3158_s6 + $0xe80] sm:$0xff] }
 0x108   : > { %2937 = vmatprep.subr.mxu1 %v979_v40  ;;  %2905 = vmatpush3.msra.mxu0 %v930_v41  ;;  %v965_v40 = vld [vmem:[%s3158_s6 + $0xf88] sm:$0xff]  ;;  %v399_v41 = vadd.s32 %v3215_v54, %v364_v29  ;;  %vm429_vm14 = vcmp.lt.s32.totalorder %v396_v36, 16641 }
 0x109   : > { %2938 = vmatpush3.msra.mxu1 %v963_v43  ;;  %2906 = vmatprep.subr.mxu0 %v945_v44  ;;  %v916_v43 = vld [vmem:[%s3158_s6 + $0xe00] sm:$0xff]  ;;  %v328_v44 = vld [vmem:[%s3153_s27 + $0xe8] sm:$0xff] }
 0x10a   : > { %2939 = vmatprep.subr.mxu1 %v978_v45  ;;  %2907 = vmatpush3.msra.mxu0 %v929_v46  ;;  %v398_v45 = vadd.s32 %v3215_v54, %v363_v33  ;;  %v949_v46 = vld [vmem:[%s3158_s6 + $0xf08] sm:$0xff]  ;;  %vm432_vm15 = vcmp.lt.s32.totalorder %v399_v41, 16641 }
 0x10b   : > { %2940 = vmatpush3.msra.mxu1 %v962_v47  ;;  %2908 = vmatprep.subr.mxu0 %v944_v48  ;;  %v327_v47 = vld [vmem:[%s3153_s27 + $0xe0] sm:$0xff] }
 0x10c   : > { %2941 = vmatprep.subr.mxu1 %v977_v49  ;;  %2909 = vmatpush3.msra.mxu0 %v928_v50  ;;  %v964_v48 = vld [vmem:[%s3158_s6 + $0xf80] sm:$0xff]  ;;  %v330_v50 = vld [vmem:[%s3153_s27 + $0xf8] sm:$0xff]  ;;  %vm431_vm0 = vcmp.lt.s32.totalorder %v398_v45, 16641 }
 0x10d   : > { %2942 = vmatpush3.msra.mxu1 %v961_v51  ;;  %2910 = vmatprep.subr.mxu0 %v943_v52  ;;  %v948_v49 = vld [vmem:[%s3158_s6 + $0xf00] sm:$0xff]  ;;  %v995_v51 = vld [vmem:[%s3158_s6 + $0x1078] sm:$0xff]  ;;  %v329_v52 = vld [vmem:[%s3153_s27 + $0xf0] sm:$0xff] }
 0x10e   : > { %2943 = vmatprep.subr.mxu1 %v976_v53  ;;  %2911 = vmatpush3.msra.mxu0 %v927_v55  ;;  %v3094_v53 = vmov 0.0   ;;  %v994_v55 = vld [vmem:[%s3158_s6 + $0x1070] sm:$0xff] }
 0x10f   : > { %2944 = vmatpush3.msra.mxu1 %v960_v56  ;;  %2912 = vmatprep.subr.mxu0 %v942_v57  ;;  %v993_v56 = vld [vmem:[%s3158_s6 + $0x1068] sm:$0xff]  ;;  %v992_v57 = vld [vmem:[%s3158_s6 + $0x1060] sm:$0xff] }
 0x110   : > { %2945 = vmatprep.subr.mxu1 %v975_v58  ;;  %2913 = vmatpush3.msra.mxu0 %v926_v59  ;;  %v991_v58 = vld [vmem:[%s3158_s6 + $0x1058] sm:$0xff]  ;;  %v990_v59 = vld [vmem:[%s3158_s6 + $0x1050] sm:$0xff] }
 0x111   : > { %2946 = vmatpush3.msra.mxu1 %v959_v60  ;;  %2914 = vmatprep.subr.mxu0 %v941_v61  ;;  %v989_v60 = vld [vmem:[%s3158_s6 + $0x1048] sm:$0xff]  ;;  %v988_v61 = vld [vmem:[%s3158_s6 + $0x1040] sm:$0xff] }
 0x112   : > { %2947 = vmatprep.subr.mxu1 %v974_v62  ;;  %2915 = vmatpush3.msra.mxu0 %v925_v63  ;;  %v987_v62 = vld [vmem:[%s3158_s6 + $0x1038] sm:$0xff]  ;;  %v986_v63 = vld [vmem:[%s3158_s6 + $0x1030] sm:$0xff] }
 0x113   : > { %2948 = vmatpush3.msra.mxu1 %v958_v0  ;;  %2916 = vmatprep.subr.mxu0 %v940_v1  ;;  %v985_v0 = vld [vmem:[%s3158_s6 + $0x1028] sm:$0xff]  ;;  %v984_v1 = vld [vmem:[%s3158_s6 + $0x1020] sm:$0xff] }
 0x114   : > { %2949 = vmatprep.subr.mxu1 %v973_v2  ;;  %2917 = vmatpush3.msra.mxu0 %v924_v3  ;;  %v365_v2 = vadd.s32 4096, %v3201_v42  ;;  %v983_v3 = vld [vmem:[%s3158_s6 + $0x1018] sm:$0xff]  ;;  %v2444_v42 = vpop.f32.mrf.mxu0 }
 0x115   : > { %2950 = vmatpush3.msra.mxu1 %v957_v4  ;;  %2918 = vmatprep.subr.mxu0 %v939_v5  ;;  %v982_v4 = vld [vmem:[%s3158_s6 + $0x1010] sm:$0xff] }
 0x116   : > { %2951 = vmatprep.subr.mxu1 %v972_v6  ;;  %2919 = vmatpush3.msra.mxu0 %v923_v7  ;;  %v400_v5 = vadd.s32 %v3215_v54, %v365_v2  ;;  %v981_v6 = vld [vmem:[%s3158_s6 + $0x1008] sm:$0xff]  ;;  %v980_v7 = vld [vmem:[%s3158_s6 + $0x1000] sm:$0xff] }
 0x117   : > { %2952 = vmatpush3.msra.mxu1 %v956_v8  ;;  %2920 = vmatprep.subr.mxu0 %v938_v9  ;;  %v331_v8 = vld [vmem:[%s3153_s27 + $0x100] sm:$0xff]  ;;  %v2479_v9 = vpop.f32.mrf.mxu1 }
 0x118   : > { %2953 = vmatprep.subr.mxu1 %v971_v10  ;;  %2921 = vmatpush3.msra.mxu0 %v922_v11  ;;  %vm433_vm2 = vcmp.lt.s32.totalorder %v400_v5, 16641  ;;  %v2445_v10 = vpop.f32.mrf.mxu0 }
 0x119   : > { %2954 = vmatpush3.msra.mxu1 %v955_v12  ;;  %2922 = vmatprep.subr.mxu0 %v937_v13  ;;  %v2480_v12 = vpop.f32.mrf.mxu1 }
 0x11a   : > { %2955 = vmatprep.subr.mxu1 %v970_v14  ;;  %2923 = vmatpush3.msra.mxu0 %v921_v15  ;;  %v2514_v11 = vpop.f32.mrf.mxu0  ;;  %v2446_v15 = vadd.f32 %v2445_v10, %v2444_v42  ;;  %v2481_v54 = vadd.f32 %v2480_v12, %v2479_v9 }
 0x11b   : > { %2956 = vmatpush3.msra.mxu1 %v954_v16  ;;  %2924 = vmatprep.subr.mxu0 %v936_v17 }
 0x11c   : > { %2957 = vmatprep.subr.mxu1 %v969_v18  ;;  %2925 = vmatpush3.msra.mxu0 %v920_v19  ;;  %v2515_v13 = vpop.f32.mrf.mxu0  ;;  %v1133_v19 = vadd.f32 %v2481_v54, %v2446_v15 }
 0x11d   : > { %2958 = vmatpush3.msra.mxu1 %v953_v20  ;;  %2926 = vmatprep.subr.mxu0 %v935_v22  ;;  %v2549_v14 = vpop.f32.mrf.mxu1  ;;  %v2516_v17 = vadd.f32 %v2515_v13, %v2514_v11 }
 0x11e   : > { %2959 = vmatprep.subr.mxu1 %v968_v23  ;;  %2927 = vmatpush3.msra.mxu0 %v919_v25 }
 0x11f   : > { %2960 = vmatpush3.msra.mxu1 %v952_v26  ;;  %2928 = vmatprep.subr.mxu0 %v934_v27  ;;  %v2550_v18 = vpop.f32.mrf.mxu1  ;;  %v1203_v22 = vadd.f32 %v2516_v17, %v1133_v19 }
 0x120   : > { %2961 = vmatprep.subr.mxu1 %v967_v28  ;;  %2929 = vmatpush3.msra.mxu0 %v918_v30  ;;  %v2551_v23 = vadd.f32 %v2550_v18, %v2549_v14 }
 0x121   : > { %2962 = vmatpush3.msra.mxu1 %v951_v31  ;;  %2930 = vmatprep.subr.mxu0 %v933_v34 }
 0x122   : > { %2963 = vmatprep.subr.mxu1 %v966_v35  ;;  %2931 = vmatpush3.msra.mxu0 %v917_v37  ;;  %v1273_v27 = vadd.f32 %v2551_v23, %v1203_v22 }
 0x123   : > { %2964 = vmatpush3.msra.mxu1 %v950_v38  ;;  %2932 = vmatprep.subr.mxu0 %v932_v39 }
 0x124   : > { %2965 = vmatprep.subr.mxu1 %v965_v40  ;;  %2933 = vmatpush3.msra.mxu0 %v916_v43 }
 0x125   : > { %2400 = vmatprep.mubr.msk.f32.mxu0 %vm430_vm13, %v328_v44  ;;  %2966 = vmatpush3.msra.mxu1 %v949_v46 }
 0x126   : > { %2401 = vmatmul.mubr.msk.f32.vlgmr.msra.gmra.mxu0 %vm429_vm14, %v327_v47  ;;  %2967 = vmatprep.subr.mxu1 %v964_v48 }
 0x127   : > { %2994 = vmatprep.subr.mxu0 %v3094_v53  ;;  %2968 = vmatpush3.msra.mxu1 %v948_v49 }
 0x128   : > { %2402 = vmatprep.mubr.msk.f32.mxu1 %vm432_vm15, %v330_v50  ;;  %2995 = vmatpush3.msra.mxu0 %v995_v51 }
 0x129   : > { %2403 = vmatmul.mubr.msk.f32.vlgmr.msra.gmra.mxu1 %vm431_vm0, %v329_v52  ;;  %2996 = vmatprep.subr.mxu0 %v3094_v53 }
 0x12a   : > { %3026 = vmatprep.mubr.msk.f32.mxu0 %vm3095_vm1, %v3094_v53  ;;  %2997 = vmatpush3.msra.mxu0 %v994_v55 }
 0x12b   : > { %2998 = vmatprep.subr.mxu0 %v3094_v53 }
 0x12c   : > { %2999 = vmatpush3.msra.mxu0 %v993_v56 }
 0x12d   : > { %3000 = vmatprep.subr.mxu0 %v3094_v53 }
 0x12e   : > { %3001 = vmatpush3.msra.mxu0 %v992_v57 }
 0x12f   : > { %3002 = vmatprep.subr.mxu0 %v3094_v53 }
 0x130   : > { %3003 = vmatpush3.msra.mxu0 %v991_v58 }
 0x131   : > { %3004 = vmatprep.subr.mxu0 %v3094_v53 }
 0x132   : > { %3005 = vmatpush3.msra.mxu0 %v990_v59 }
 0x133   : > { %3006 = vmatprep.subr.mxu0 %v3094_v53 }
 0x134   : > { %3007 = vmatpush3.msra.mxu0 %v989_v60 }
 0x135   : > { %3008 = vmatprep.subr.mxu0 %v3094_v53 }
 0x136   : > { %3009 = vmatpush3.msra.mxu0 %v988_v61 }
 0x137   : > { %3010 = vmatprep.subr.mxu0 %v3094_v53 }
 0x138   : > { %3011 = vmatpush3.msra.mxu0 %v987_v62 }
 0x139   : > { %3012 = vmatprep.subr.mxu0 %v3094_v53 }
 0x13a   : > { %3013 = vmatpush3.msra.mxu0 %v986_v63 }
 0x13b   : > { %3014 = vmatprep.subr.mxu0 %v3094_v53 }
 0x13c   : > { %3015 = vmatpush3.msra.mxu0 %v985_v0  ;;  %v2584_v16 = vpop.f32.mrf.mxu0 }
 0x13d   : > { %3016 = vmatprep.subr.mxu0 %v3094_v53 }
 0x13e   : > { %3017 = vmatpush3.msra.mxu0 %v984_v1  ;;  %v2585_v20 = vpop.f32.mrf.mxu0 }
 0x13f   : > { %3018 = vmatprep.subr.mxu0 %v3094_v53  ;;  %v2619_v21 = vpop.f32.mrf.mxu1  ;;  %v2586_v25 = vadd.f32 %v2585_v20, %v2584_v16 }
 0x140   : > { %3019 = vmatpush3.msra.mxu0 %v983_v3 }
 0x141   : > { %3020 = vmatprep.subr.mxu0 %v3094_v53  ;;  %v2620_v26 = vpop.f32.mrf.mxu1  ;;  %v1343_v30 = vadd.f32 %v2586_v25, %v1273_v27 }
 0x142   : > { %3021 = vmatpush3.msra.mxu0 %v982_v4  ;;  %v2621_v31 = vadd.f32 %v2620_v26, %v2619_v21 }
 0x143   : > { %3022 = vmatprep.subr.mxu0 %v3094_v53 }
 0x144   : > { %3023 = vmatpush3.msra.mxu0 %v981_v6  ;;  %v1413_v35 = vadd.f32 %v2621_v31, %v1343_v30 }
 0x145   : > { %3024 = vmatprep.subr.mxu0 %v3094_v53 }
 0x146   : > { %3025 = vmatpush3.msra.mxu0 %v980_v7 }
 0x147   : > { %3027 = vmatmul.mubr.msk.f32.vlgmr.msra.gmra.mxu0 %vm433_vm2, %v331_v8  ;;  %v467_v8 = vld [vmem:[#allocation2] sm:$0xff] }
 0x15e   : > { %v2654_v24 = vpop.f32.mrf.mxu0 }
 0x160   : > { %v2655_v28 = vpop.f32.mrf.mxu0 }
 0x161   : > { %v2689_v29 = vpop.f32.mrf.mxu1  ;;  %v2656_v33 = vadd.f32 %v2655_v28, %v2654_v24 }
 0x163   : > { %v2690_v34 = vpop.f32.mrf.mxu1  ;;  %v1483_v38 = vadd.f32 %v2656_v33, %v1413_v35 }
 0x164   : > { %v2691_v39 = vadd.f32 %v2690_v34, %v2689_v29 }
 0x166   : > { %v1553_v44 = vadd.f32 %v2691_v39, %v1483_v38 }
 0x180   : > { %v2724_v32 = vpop.f32.mrf.mxu0 }
 0x182   : > { %v2725_v36 = vpop.f32.mrf.mxu0 }
 0x183   : > { %v2759_v37 = vpop.f32.mrf.mxu1  ;;  %v2726_v41 = vadd.f32 %v2725_v36, %v2724_v32 }
 0x185   : > { %v2760_v43 = vpop.f32.mrf.mxu1  ;;  %v1623_v47 = vadd.f32 %v2726_v41, %v1553_v44 }
 0x186   : > { %v2761_v48 = vadd.f32 %v2760_v43, %v2759_v37 }
 0x188   : > { %v1693_v52 = vadd.f32 %v2761_v48, %v1623_v47 }
 0x1a2   : > { %v2794_v40 = vpop.f32.mrf.mxu0 }
 0x1a4   : > { %v2795_v45 = vpop.f32.mrf.mxu0 }
 0x1a5   : > { %v2829_v46 = vpop.f32.mrf.mxu1  ;;  %v2796_v50 = vadd.f32 %v2795_v45, %v2794_v40 }
 0x1a7   : > { %v2830_v51 = vpop.f32.mrf.mxu1  ;;  %v1763_v56 = vadd.f32 %v2796_v50, %v1693_v52 }
 0x1a8   : > { %v2831_v57 = vadd.f32 %v2830_v51, %v2829_v46 }
 0x1aa   : > { %v1833_v61 = vadd.f32 %v2831_v57, %v1763_v56 }
 0x1c4   : > { %v2864_v49 = vpop.f32.mrf.mxu0 }
 0x1c6   : > { %v2865_v53 = vpop.f32.mrf.mxu0 }
 0x1c7   : > { %v2899_v55 = vpop.f32.mrf.mxu1  ;;  %v2866_v59 = vadd.f32 %v2865_v53, %v2864_v49 }
 0x1c9   : > { %v2900_v60 = vpop.f32.mrf.mxu1  ;;  %v1903_v0 = vadd.f32 %v2866_v59, %v1833_v61 }
 0x1ca   : > { %v2901_v1 = vadd.f32 %v2900_v60, %v2899_v55 }
 0x1cc   : > { %v1973_v4 = vadd.f32 %v2901_v1, %v1903_v0 }
 0x1e6   : > { %v2934_v58 = vpop.f32.mrf.mxu0 }
 0x1e8   : > { %v2935_v62 = vpop.f32.mrf.mxu0 }
 0x1e9   : > { %v2969_v63 = vpop.f32.mrf.mxu1  ;;  %v2936_v2 = vadd.f32 %v2935_v62, %v2934_v58 }
 0x1eb   : > { %v2970_v3 = vpop.f32.mrf.mxu1  ;;  %v2043_v5 = vadd.f32 %v2936_v2, %v1973_v4 }
 0x1ec   : > { %v2971_v6 = vadd.f32 %v2970_v3, %v2969_v63 }
 0x1ee   : > { %v2113_v7 = vadd.f32 %v2971_v6, %v2043_v5 }
 0x207   : > { %v2182_v42 = vpop.f32.mrf.mxu0 }
 0x208   : > { %v2183_v9 = vadd.f32 %v2182_v42, %v2113_v7  ;;  %2192 = sbr.rel (%p2405_p7) target bundleno = 732 (0x2dc), region = 48 }
 0x209   : > { %v3028_v10 = vpop.f32.mrf.mxu0 }
 0x20a   : > { %v2186_v11 = vadd.f32 %v2183_v9, %v467_v8 }
 0x20c   : > { %2188 = vst.msk [vmem:[#allocation2] sm:$0xff] %vm2187_vm3, %v2186_v11 }
 0x20d   : > { %v2206_v12 = vld [vmem:[%s3829_s3 + $0x18] sm:$0xff]  ;;  %v3096_v13 = vmov 0.0   ;;  %v2205_v14 = vld [vmem:[%s3829_s3 + $0x10] sm:$0xff]  ;;  %vm3097_vm4 = vmmov 0   ;;  %v2406_v54 = vld [vmem:[%s3828_s2] ss:$0 sm:$0xff] }
 0x20e   : > { %3029 = vmatprep.subr.mxu0 %v3096_v13  ;;  %3037 = vmatprep.mubr.msk.f32.mxu0 %vm3097_vm4, %v3096_v13  ;;  %v2204_v17 = vld [vmem:[%s3829_s3 + $0x8] sm:$0xff]  ;;  %v2203_v18 = vld [vmem:[%s3829_s3] sm:$0xff] }
 0x20f   : > { %3030 = vmatpush3.msra.mxu0 %v2206_v12  ;;  %v2407_v20 = vld [vmem:[%s3830_s4] ss:$0 sm:$0xff] }
 0x210   : > { %3031 = vmatprep.subr.mxu0 %v3096_v13 }
 0x211   : > { %3032 = vmatpush3.msra.mxu0 %v2205_v14 }
 0x212   : > { %3033 = vmatprep.subr.mxu0 %v3096_v13 }
 0x213   : > { %v2193_v15 = vld [vmem:[#allocation2] sm:$0xff]  ;;  %3034 = vmatpush3.msra.mxu0 %v2204_v17 }
 0x214   : > { %v2201_v16 = vadd.f32 %v2406_v54, %v2193_v15  ;;  %3035 = vmatprep.subr.mxu0 %v3096_v13 }
 0x215   : > { %3036 = vmatpush3.msra.mxu0 %v2203_v18 }
 0x216   : > { %v2202_v19 = vmax.f32 %v2201_v16, 0.0 }
 0x218   : > { %3038 = vmatmul.mubr.msk.f32.vlgmr.msra.gmra.mxu0 %vm2187_vm3, %v2202_v19 }
 0x2d8   : > { %v2283_v21 = vpop.f32.mrf.mxu0 }
 0x2d9   : > { %v2284_v22 = vadd.f32 %v2407_v20, %v2283_v21 }
 0x2da   : > { %v3039_v23 = vpop.f32.mrf.mxu0 }
 0x2db   : > { %2287 = vst [vmem:[%s3831_s5] sm:$0xff] %v2284_v22 }
 0x2dc PF: > { %s15_s20 = sadd.s32 1, %s3091_s20   ;;  %s3832_s18 = smov %s3087_s19 }
 0x2dd   : > { %p12_p8 = scmp.ge.s32.totalorder %s15_s20, 6   ;;  %s3833_s19 = smov %s3835_s21 }
 0x2df   :  { %14 = sbr.rel (!%p12_p8) target bundleno = 2 (0x2), region = 81 }

</bundles_post_ra>
